<compile_context>
chip_gen: v7x
topology: tpu7x:2x2x1
jax: 0.10.0
libtpu: 0.0.40
codegen_flags: <defaults>
</compile_context>

<pallas_src>
import functools
import math

import jax
import jax.numpy as jnp
from jax.experimental import pallas as pl
from jax.experimental.pallas import tpu as pltpu


def _vae_kernel(x_ref, eps_ref,
                wx_ref, bx_ref,
                wml_ref, bml_ref,
                wz_ref, bz_ref,
                wout_ref, bout_ref,
                recon_ref, mulv_ref):
    L = eps_ref.shape[-1]
    cdt = wx_ref.dtype          # MXU input dtype (f32 or bf16); accumulation is f32

    x = x_ref[...]              # (TB, D)
    eps = eps_ref[...]          # (TB, L)

    # ---- encode ----
    he = jnp.tanh(
        jnp.dot(x.astype(cdt), wx_ref[...],
                preferred_element_type=jnp.float32) + bx_ref[...])       # (TB, H)
    # fused mean||logvar projection: one lane-dense (TB, 2L) matmul
    ml = jnp.dot(he.astype(cdt), wml_ref[...],
                 preferred_element_type=jnp.float32) + bml_ref[...]      # (TB, 2L)
    mu = ml[:, :L]
    logvar = ml[:, L:]

    # ---- reparameterize ----
    z = eps * jnp.exp(0.5 * logvar) + mu                                 # (TB, L)

    # ---- decode ----
    hd = jnp.tanh(
        jnp.dot(z.astype(cdt), wz_ref[...],
                preferred_element_type=jnp.float32) + bz_ref[...])       # (TB, H)
    out = jnp.dot(hd.astype(cdt), wout_ref[...],
                  preferred_element_type=jnp.float32) + bout_ref[...]    # (TB, D)

    recon_ref[...] = jnp.exp(out).astype(recon_ref.dtype)
    mulv_ref[...] = ml.astype(mulv_ref.dtype)   # packed mu||logvar, lane-dense store


@functools.partial(jax.jit, static_argnames=("tile_b",))
def _vae_pallas(x, eps, params, *, tile_b=128):
    B, D = x.shape
    L = eps.shape[1]
    H = params["wx"].shape[1]
    L2 = params["wml"].shape[1]          # 2 * latent_dim (packed mu||logvar)

    tile_b = min(tile_b, B)
    assert B % tile_b == 0, f"batch {B} must be a multiple of tile_b {tile_b}"

    def fixed(arr):  # full-array block, same block every grid step
        return pl.BlockSpec(arr.shape, lambda i: (0, 0))

    grid = (B // tile_b,)

    # Advisory cost estimate so XLA can schedule surrounding ops around the call.
    flops = 2 * B * (D * H + H * L2 + L * H + H * D)
    transcendentals = B * (2 * H + L + D)
    param_bytes = sum(math.prod(v.shape) * v.dtype.itemsize for v in params.values())
    bytes_accessed = (x.size + eps.size + B * D + B * L2) * 4 + param_bytes

    recon, mulv = pl.pallas_call(
        _vae_kernel,
        out_shape=(
            jax.ShapeDtypeStruct((B, D), jnp.float32),    # recon
            jax.ShapeDtypeStruct((B, L2), jnp.float32),   # packed mu||logvar
        ),
        grid_spec=pltpu.PrefetchScalarGridSpec(
            num_scalar_prefetch=0,
            grid=grid,
            in_specs=[
                pl.BlockSpec((tile_b, D), lambda i: (i, 0)),   # x
                pl.BlockSpec((tile_b, L), lambda i: (i, 0)),   # eps
                fixed(params["wx"]), fixed(params["bx"]),      # encoder_layerX
                fixed(params["wml"]), fixed(params["bml"]),    # latent mean||logvar (fused)
                fixed(params["wz"]), fixed(params["bz"]),      # decoder_layerZ
                fixed(params["wout"]), fixed(params["bout"]),  # output_layer
            ],
            out_specs=(
                pl.BlockSpec((tile_b, D), lambda i: (i, 0)),
                pl.BlockSpec((tile_b, L2), lambda i: (i, 0)),
            ),
        ),
        compiler_params=pltpu.CompilerParams(
            dimension_semantics=("parallel",),
            vmem_limit_bytes=32 * 1024 * 1024,
        ),
        cost_estimate=pl.CostEstimate(
            flops=flops,
            transcendentals=transcendentals,
            bytes_accessed=bytes_accessed,
        ),
    )(
        x, eps,
        params["wx"], params["bx"],
        params["wml"], params["bml"],
        params["wz"], params["bz"],
        params["wout"], params["bout"],
    )
    # Split the packed lane-dense slab back into mu / logvar in the wrapper
    # (cheap XLA slice in HBM; keeps the kernel's stores unmasked / lane-dense).
    return recon, mulv[:, :L], mulv[:, L:]


def vae_inner_forward(x, eps, params, *, tile_b=128):
    """Pallas implementation of VAE_inner.forward -> (recon, mu, logvar)."""
    return _vae_pallas(x, eps, params, tile_b=tile_b)


def init_params(key, input_dim, latent_dim, hidden_dim):
    """Deterministic synthetic params, nn.Linear-style init.
    Weights stored transposed: (in, out). latent_mean/logvar weights are packed
    into a single (hidden, 2*latent) matrix for one lane-dense matmul."""
    ks = jax.random.split(key, 10)

    def lin(kw, kb, fan_in, fan_out):
        bound = 1.0 / jnp.sqrt(fan_in)
        w = jax.random.uniform(kw, (fan_in, fan_out), jnp.float32, -bound, bound)
        b = jax.random.uniform(kb, (1, fan_out), jnp.float32, -bound, bound)
        return w, b

    wx, bx = lin(ks[0], ks[1], input_dim, hidden_dim)        # encoder_layerX
    wmu, bmu = lin(ks[2], ks[3], hidden_dim, latent_dim)     # latent_mean_layer
    wlv, blv = lin(ks[4], ks[5], hidden_dim, latent_dim)     # latent_logvar_layer
    wz, bz = lin(ks[6], ks[7], latent_dim, hidden_dim)       # decoder_layerZ
    wout, bout = lin(ks[8], ks[9], hidden_dim, input_dim)    # output_layer
    return dict(
        wx=wx, bx=bx,
        wml=jnp.concatenate([wmu, wlv], axis=1),   # (H, 2L)
        bml=jnp.concatenate([bmu, blv], axis=1),   # (1, 2L)
        wz=wz, bz=bz, wout=wout, bout=bout,
    )


def reference_forward(x, eps, p):
    L = eps.shape[1]
    he = jnp.tanh(x @ p["wx"].astype(jnp.float32) + p["bx"])
    ml = he @ p["wml"].astype(jnp.float32) + p["bml"]
    mu, logvar = ml[:, :L], ml[:, L:]
    z = eps * jnp.exp(0.5 * logvar) + mu
    hd = jnp.tanh(z @ p["wz"].astype(jnp.float32) + p["bz"])
    recon = jnp.exp(hd @ p["wout"].astype(jnp.float32) + p["bout"])
    return recon, mu, logvar


if __name__ == "__main__":
    # Small shapes consistent with the module (input_dim, latent_dim, hidden_dim_encoder).
    # input_dim kept a multiple of 128 for lane-dense loads/stores; batch=256 gives
    # two 128-row parallel grid steps (both v7x TensorCores busy, full MXU height).
    B, INPUT_DIM, LATENT_DIM, HIDDEN_DIM = 256, 256, 64, 128

    key = jax.random.PRNGKey(0)
    k_x, k_eps, k_p = jax.random.split(key, 3)

    x = jax.random.normal(k_x, (B, INPUT_DIM), jnp.float32) * 0.1
    eps = jax.random.normal(k_eps, (B, LATENT_DIM), jnp.float32)
    params = init_params(k_p, INPUT_DIM, LATENT_DIM, HIDDEN_DIM)

    # ---- f32 path (tight check vs pure-JAX reference) ----
    recon, mu, logvar = vae_inner_forward(x, eps, params, tile_b=128)
    jax.block_until_ready((recon, mu, logvar))

    r_ref, mu_ref, lv_ref = reference_forward(x, eps, params)
    assert jnp.allclose(recon, r_ref, atol=1e-4, rtol=1e-4)
    assert jnp.allclose(mu, mu_ref, atol=1e-5, rtol=1e-5)
    assert jnp.allclose(logvar, lv_ref, atol=1e-5, rtol=1e-5)

    # ---- bf16-weight path (v6e/v7x MXU-native weights, f32 accumulation) ----
    params_bf16 = {k: (v.astype(jnp.bfloat16) if k.startswith("w") else v)
                   for k, v in params.items()}
    recon_b, mu_b, logvar_b = vae_inner_forward(x, eps, params_bf16, tile_b=128)
    jax.block_until_ready((recon_b, mu_b, logvar_b))
    assert jnp.allclose(recon_b, r_ref, atol=5e-2, rtol=5e-2)
    assert jnp.allclose(mu_b, mu_ref, atol=5e-2, rtol=5e-2)
    assert jnp.allclose(logvar_b, lv_ref, atol=5e-2, rtol=5e-2)

    print("KERNEL_OK")
</pallas_src>

<mosaic_0001>
module attributes {stable_mosaic.version = 11 : i64} {
  func.func @_vae_kernel(%arg0: i32, %arg1: memref<128x256xf32, #tpu.memory_space<vmem>>, %arg2: memref<128x64xf32, #tpu.memory_space<vmem>>, %arg3: memref<256x128xf32, #tpu.memory_space<vmem>>, %arg4: memref<1x128xf32, #tpu.memory_space<vmem>>, %arg5: memref<128x128xf32, #tpu.memory_space<vmem>>, %arg6: memref<1x128xf32, #tpu.memory_space<vmem>>, %arg7: memref<64x128xf32, #tpu.memory_space<vmem>>, %arg8: memref<1x128xf32, #tpu.memory_space<vmem>>, %arg9: memref<128x256xf32, #tpu.memory_space<vmem>>, %arg10: memref<1x256xf32, #tpu.memory_space<vmem>>, %arg11: memref<128x256xf32, #tpu.memory_space<vmem>>, %arg12: memref<128x128xf32, #tpu.memory_space<vmem>>) attributes {dimension_semantics = [#tpu.dimension_semantics<parallel>], iteration_bounds = array<i64: 2>, scalar_prefetch = 0 : i64, scratch_operands = 0 : i64, tpu.core_type = #tpu.core_type<tc>, window_params = [{transform_indices = @transform_0, window_bounds = array<i64: 128, 256>}, {transform_indices = @transform_1, window_bounds = array<i64: 128, 64>}, {pipeline_mode = #tpu.pipeline_mode<synchronous>, transform_indices = @transform_2, window_bounds = array<i64: 256, 128>}, {pipeline_mode = #tpu.pipeline_mode<synchronous>, transform_indices = @transform_3, window_bounds = array<i64: 1, 128>}, {pipeline_mode = #tpu.pipeline_mode<synchronous>, transform_indices = @transform_4, window_bounds = array<i64: 128, 128>}, {pipeline_mode = #tpu.pipeline_mode<synchronous>, transform_indices = @transform_5, window_bounds = array<i64: 1, 128>}, {pipeline_mode = #tpu.pipeline_mode<synchronous>, transform_indices = @transform_6, window_bounds = array<i64: 64, 128>}, {pipeline_mode = #tpu.pipeline_mode<synchronous>, transform_indices = @transform_7, window_bounds = array<i64: 1, 128>}, {pipeline_mode = #tpu.pipeline_mode<synchronous>, transform_indices = @transform_8, window_bounds = array<i64: 128, 256>}, {pipeline_mode = #tpu.pipeline_mode<synchronous>, transform_indices = @transform_9, window_bounds = array<i64: 1, 256>}, {transform_indices = @transform_10, window_bounds = array<i64: 128, 256>}, {transform_indices = @transform_11, window_bounds = array<i64: 128, 128>}]} {
    %c0 = arith.constant 0 : index
    %c0_0 = arith.constant 0 : index
    %0 = vector.load %arg1[%c0, %c0_0] : memref<128x256xf32, #tpu.memory_space<vmem>>, vector<128x256xf32>
    %c0_1 = arith.constant 0 : index
    %c0_2 = arith.constant 0 : index
    %1 = vector.load %arg2[%c0_1, %c0_2] : memref<128x64xf32, #tpu.memory_space<vmem>>, vector<128x64xf32>
    %c0_3 = arith.constant 0 : index
    %c0_4 = arith.constant 0 : index
    %2 = vector.load %arg3[%c0_3, %c0_4] : memref<256x128xf32, #tpu.memory_space<vmem>>, vector<256x128xf32>
    %cst = arith.constant dense<0.000000e+00> : vector<128x128xf32>
    %3 = tpu.matmul %0, %2, %cst {dimension_numbers = #tpu.dot_dimension_numbers<[1], [0], [0], [1], [0, 0, 1, 1], [], []>} : vector<128x256xf32>, vector<256x128xf32>, vector<128x128xf32> -> vector<128x128xf32>
    %c0_5 = arith.constant 0 : index
    %c0_6 = arith.constant 0 : index
    %4 = vector.load %arg4[%c0_5, %c0_6] : memref<1x128xf32, #tpu.memory_space<vmem>>, vector<1x128xf32>
    %5 = vector.broadcast %4 : vector<1x128xf32> to vector<128x128xf32>
    %6 = arith.addf %3, %5 : vector<128x128xf32>
    %7 = math.tanh %6 : vector<128x128xf32>
    %c0_7 = arith.constant 0 : index
    %c0_8 = arith.constant 0 : index
    %8 = vector.load %arg5[%c0_7, %c0_8] : memref<128x128xf32, #tpu.memory_space<vmem>>, vector<128x128xf32>
    %cst_9 = arith.constant dense<0.000000e+00> : vector<128x128xf32>
    %9 = tpu.matmul %7, %8, %cst_9 {dimension_numbers = #tpu.dot_dimension_numbers<[1], [0], [0], [1], [0, 0, 1, 1], [], []>} : vector<128x128xf32>, vector<128x128xf32>, vector<128x128xf32> -> vector<128x128xf32>
    %c0_10 = arith.constant 0 : index
    %c0_11 = arith.constant 0 : index
    %10 = vector.load %arg6[%c0_10, %c0_11] : memref<1x128xf32, #tpu.memory_space<vmem>>, vector<1x128xf32>
    %11 = vector.broadcast %10 : vector<1x128xf32> to vector<128x128xf32>
    %12 = arith.addf %9, %11 : vector<128x128xf32>
    %13 = vector.extract_strided_slice %12 {offsets = [0, 0], sizes = [128, 64], strides = [1, 1]} : vector<128x128xf32> to vector<128x64xf32>
    %14 = vector.extract_strided_slice %12 {offsets = [0, 64], sizes = [128, 64], strides = [1, 1]} : vector<128x128xf32> to vector<128x64xf32>
    %cst_12 = arith.constant 5.000000e-01 : f32
    %15 = vector.broadcast %cst_12 : f32 to vector<128x64xf32>
    %16 = arith.mulf %15, %14 : vector<128x64xf32>
    %17 = math.exp %16 : vector<128x64xf32>
    %18 = arith.mulf %1, %17 : vector<128x64xf32>
    %19 = arith.addf %18, %13 : vector<128x64xf32>
    %c0_13 = arith.constant 0 : index
    %c0_14 = arith.constant 0 : index
    %20 = vector.load %arg7[%c0_13, %c0_14] : memref<64x128xf32, #tpu.memory_space<vmem>>, vector<64x128xf32>
    %cst_15 = arith.constant dense<0.000000e+00> : vector<128x128xf32>
    %21 = tpu.matmul %19, %20, %cst_15 {dimension_numbers = #tpu.dot_dimension_numbers<[1], [0], [0], [1], [0, 0, 1, 1], [], []>} : vector<128x64xf32>, vector<64x128xf32>, vector<128x128xf32> -> vector<128x128xf32>
    %c0_16 = arith.constant 0 : index
    %c0_17 = arith.constant 0 : index
    %22 = vector.load %arg8[%c0_16, %c0_17] : memref<1x128xf32, #tpu.memory_space<vmem>>, vector<1x128xf32>
    %23 = vector.broadcast %22 : vector<1x128xf32> to vector<128x128xf32>
    %24 = arith.addf %21, %23 : vector<128x128xf32>
    %25 = math.tanh %24 : vector<128x128xf32>
    %c0_18 = arith.constant 0 : index
    %c0_19 = arith.constant 0 : index
    %26 = vector.load %arg9[%c0_18, %c0_19] : memref<128x256xf32, #tpu.memory_space<vmem>>, vector<128x256xf32>
    %cst_20 = arith.constant dense<0.000000e+00> : vector<128x256xf32>
    %27 = tpu.matmul %25, %26, %cst_20 {dimension_numbers = #tpu.dot_dimension_numbers<[1], [0], [0], [1], [0, 0, 1, 1], [], []>} : vector<128x128xf32>, vector<128x256xf32>, vector<128x256xf32> -> vector<128x256xf32>
    %c0_21 = arith.constant 0 : index
    %c0_22 = arith.constant 0 : index
    %28 = vector.load %arg10[%c0_21, %c0_22] : memref<1x256xf32, #tpu.memory_space<vmem>>, vector<1x256xf32>
    %29 = vector.broadcast %28 : vector<1x256xf32> to vector<128x256xf32>
    %30 = arith.addf %27, %29 : vector<128x256xf32>
    %31 = math.exp %30 : vector<128x256xf32>
    %c0_23 = arith.constant 0 : index
    %c0_24 = arith.constant 0 : index
    %32 = vector.load %arg11[%c0_23, %c0_24] : memref<128x256xf32, #tpu.memory_space<vmem>>, vector<128x256xf32>
    tpu.vector_store %arg11[%c0_23, %c0_24], %31 {strides = array<i32>} : memref<128x256xf32, #tpu.memory_space<vmem>>, vector<128x256xf32>,
    %c0_25 = arith.constant 0 : index
    %c0_26 = arith.constant 0 : index
    %33 = vector.load %arg12[%c0_25, %c0_26] : memref<128x128xf32, #tpu.memory_space<vmem>>, vector<128x128xf32>
    tpu.vector_store %arg12[%c0_25, %c0_26], %12 {strides = array<i32>} : memref<128x128xf32, #tpu.memory_space<vmem>>, vector<128x128xf32>,
    return
  }
  func.func @transform_0(%arg0: i32) -> (i32, i32) {
    %c0_i32 = arith.constant 0 : i32
    %c0_i32_0 = arith.constant 0 : i32
    return %arg0, %c0_i32 : i32, i32
  }
  func.func @transform_1(%arg0: i32) -> (i32, i32) {
    %c0_i32 = arith.constant 0 : i32
    %c0_i32_0 = arith.constant 0 : i32
    return %arg0, %c0_i32 : i32, i32
  }
  func.func @transform_2(%arg0: i32) -> (i32, i32) {
    %c0_i32 = arith.constant 0 : i32
    %c0_i32_0 = arith.constant 0 : i32
    %c0_i32_1 = arith.constant 0 : i32
    return %c0_i32, %c0_i32_0 : i32, i32
  }
  func.func @transform_3(%arg0: i32) -> (i32, i32) {
    %c0_i32 = arith.constant 0 : i32
    %c0_i32_0 = arith.constant 0 : i32
    %c0_i32_1 = arith.constant 0 : i32
    return %c0_i32, %c0_i32_0 : i32, i32
  }
  func.func @transform_4(%arg0: i32) -> (i32, i32) {
    %c0_i32 = arith.constant 0 : i32
    %c0_i32_0 = arith.constant 0 : i32
    %c0_i32_1 = arith.constant 0 : i32
    return %c0_i32, %c0_i32_0 : i32, i32
  }
  func.func @transform_5(%arg0: i32) -> (i32, i32) {
    %c0_i32 = arith.constant 0 : i32
    %c0_i32_0 = arith.constant 0 : i32
    %c0_i32_1 = arith.constant 0 : i32
    return %c0_i32, %c0_i32_0 : i32, i32
  }
  func.func @transform_6(%arg0: i32) -> (i32, i32) {
    %c0_i32 = arith.constant 0 : i32
    %c0_i32_0 = arith.constant 0 : i32
    %c0_i32_1 = arith.constant 0 : i32
    return %c0_i32, %c0_i32_0 : i32, i32
  }
  func.func @transform_7(%arg0: i32) -> (i32, i32) {
    %c0_i32 = arith.constant 0 : i32
    %c0_i32_0 = arith.constant 0 : i32
    %c0_i32_1 = arith.constant 0 : i32
    return %c0_i32, %c0_i32_0 : i32, i32
  }
  func.func @transform_8(%arg0: i32) -> (i32, i32) {
    %c0_i32 = arith.constant 0 : i32
    %c0_i32_0 = arith.constant 0 : i32
    %c0_i32_1 = arith.constant 0 : i32
    return %c0_i32, %c0_i32_0 : i32, i32
  }
  func.func @transform_9(%arg0: i32) -> (i32, i32) {
    %c0_i32 = arith.constant 0 : i32
    %c0_i32_0 = arith.constant 0 : i32
    %c0_i32_1 = arith.constant 0 : i32
    return %c0_i32, %c0_i32_0 : i32, i32
  }
  func.func @transform_10(%arg0: i32) -> (i32, i32) {
    %c0_i32 = arith.constant 0 : i32
    %c0_i32_0 = arith.constant 0 : i32
    return %arg0, %c0_i32 : i32, i32
  }
  func.func @transform_11(%arg0: i32) -> (i32, i32) {
    %c0_i32 = arith.constant 0 : i32
    %c0_i32_0 = arith.constant 0 : i32
    return %arg0, %c0_i32 : i32, i32
  }
}

</mosaic_0001>

<bundles_post_ra>
// kernel: _vae_pallas.1
= control target key start
LH: loop header
LB: loop body
LE: loop exit
PB: predicated region body
PF: predicated region fallthrough
CT: control target
= control target key end

     0   :  { %s3337_s0 = inlined_call_operand.hbm [shape: f32[256,256], index: 0, kind: input, shape index: {}]   ;;  %s3338_s1 = inlined_call_operand.vmem [shape: f32[256,64], index: 1, kind: input, shape index: {}]   ;;  %s3339_s2 = inlined_call_operand.vmem [shape: f32[256,128], index: 2, kind: input, shape index: {}]   ;;  %s3340_s3 = inlined_call_operand.vmem [shape: f32[1,128], index: 3, kind: input, shape index: {}]   ;;  %s3341_s4 = inlined_call_operand.vmem [shape: f32[128,128], index: 4, kind: input, shape index: {}]   ;;  %s3342_s5 = inlined_call_operand.vmem [shape: f32[1,128], index: 5, kind: input, shape index: {}]   ;;  %s3343_s6 = inlined_call_operand.hbm [shape: f32[64,128], index: 6, kind: input, shape index: {}]   ;;  %s3344_s7 = inlined_call_operand.vmem [shape: f32[1,128], index: 7, kind: input, shape index: {}]   ;;  %s3345_s8 = inlined_call_operand.hbm [shape: f32[128,256], index: 8, kind: input, shape index: {}]   ;;  %s3346_s9 = inlined_call_operand.vmem [shape: f32[1,256], index: 9, kind: input, shape index: {}]   ;;  %s3347_s10 = inlined_call_operand.hbm [shape: f32[256,256], index: 10, kind: output, shape index: {0}]   ;;  %s3348_s11 = inlined_call_operand.vmem [shape: f32[256,128], index: 11, kind: output, shape index: {1}]  }
   0x1   :  { %3358 = sst [smem:[#allocation14_spill]] %s3347_s10 }
   0x2   :  { %17 = vsyncpa [#allocation3], 0 }
   0x3   :  { %19 = vsyncpa [#allocation3 + $0x1], 0 }
   0x4   :  { %20 = vsyncpa [#allocation6], 0 }
   0x5   :  { %21 = vsyncpa [#allocation4], 0 }
   0x6   :  { %23 = vsyncpa [#allocation4 + $0x1], 0  ;;  %s2600_s17 = smov 0   ;;  %s2602_s18 = smov 0  }
   0x7   :  { %s2604_s19 = smov 0   ;;  %s2606_s20 = smov 0  }
   0x8 LB: > { %3359 = sst [smem:[#allocation12_spill]] %s2514_s17  ;;  %s2621_s21 = sadd.s32 4294967295, %s2526_s20   ;;  %s2526_s20 = sphi %s2606_s20, %s3383_s20   ;;  %s2522_s19 = sphi %s2604_s19, %s3382_s19   ;;  %s2518_s18 = sphi %s2602_s18, %s3381_s18   ;;  %s2514_s17 = sphi %s2600_s17, %s3380_s17  }
   0x9   : > { %s1728_s22 = sadd.s32 4294967294, %s2526_s20   ;;  %p49_p0 = scmp.ne.s32.totalorder %s2518_s18, %s2514_s17 }
   0xa   : > { %p3349_p1 = scmp.eq.s32.totalorder %s2621_s21, 0  ;;  %p273_p3 = scmp.eq.s32.totalorder %s1728_s22, 1 }
   0xb   : > { %p1729_p5 = scmp.ge.s32.totalorder %s2526_s20, 1  ;;  %p306_p7 = scmp.lt.s32.totalorder %s2526_s20, 3 }
   0xc   : > { %p2630_p4 = por %p3349_p1, %p49_p0  ;;  %p2635_p6 = por %p273_p3, %p49_p0 }
   0xd   : > { %p2640_p8 = pnand %p1729_p5, %p306_p7  ;;  %s2528_s26 = smov [#allocation5]  }
   0xe   : > { %s3360_s23 = scalar_select %p2630_p4, 1, 0 }
   0xf   : > { %s3361_s24 = scalar_select %p2635_p6, 1, 0 }
  0x10   : > { %s330_s27 = sshll.u32 %s2528_s26, 4  ;;  %p2147_p9 = pneg %p2640_p8  ;;  %s2644_s27 = int_to_ptr.vmem [resolvable:$true] %s330_s27 }
  0x11   : > { %3362 = sst [smem:[#allocation13_spill]] %s3361_s24  ;;  %s2529_s29 = smov [#allocation7]  }
  0x12   : > { %p2651_p11 = pnand %p2147_p9, %p3349_p1  ;;  %s346_s30 = sshll.u32 %s2529_s29, 4  ;;  %s2655_s30 = int_to_ptr.vmem [resolvable:$true] %s346_s30 }
  0x13   : > { %s2370_s14 = scalar_lea.hbm %s3343_s6, 1024 }
  0x14   : > { %p2371_p12 = scmp.ne.s32.totalorder %s3343_s6, %s2370_s14  ;;  %p2372_p13 = pneg %p2651_p11 }
  0x15   : > { %p2377_p5 = scmp.lt.u32.totalorder %s2370_s14, %s3343_s6 }
  0x16   : > { %p2373_p0 = pnand %p2372_p13, %p2371_p12 }
  0x18   : > { %p2374_p3 = pneg %p2373_p0 }
  0x1a   : > { %p2379_p7 = pnand %p2377_p5, %p2374_p3 }
  0x1c   : > { %2382 = shalt.err (!%p2379_p7)
}
  0x1d   : > { %s2383_s29 = scalar_lea.vmem %s2644_s27, 1024  ;;  %p2391_p2 = scmp.lt.s32.totalorder %s2644_s27, %s2644_s27 }
  0x1e   : > { %p2384_p9 = scmp.ne.s32.totalorder %s2644_s27, %s2383_s29  ;;  %p2392_p12 = scmp.lt.s32.totalorder %s2383_s29, %s2383_s29 }
  0x20   : > { %p2386_p10 = pnand %p2384_p9, %p2372_p13  ;;  %p2393_p0 = por %p2392_p12, %p2391_p2 }
  0x22   : > { %p2387_p1 = pneg %p2386_p10 }
  0x24   : > { %p2394_p6 = pnand %p2393_p0, %p2387_p1 }
  0x26   : > { %2397 = shalt.err (!%p2394_p6)
}
  0x27   : > { %s2530_s12 = smov 128   ;;  %s2531_s13 = smov 8  }
  0x28   : > { %2150 = dma.hbm_to_vmem [thread:$0]  (!%p2651_p11), %s3343_s6, 1024, %s2644_s27, [#allocation6], %s2530_s12, %s2530_s12, %s2531_s13  }
  0x29   : > { %s2398_s26 = scalar_lea.hbm %s3345_s8, 4096 }
  0x2a   : > { %p2399_p2 = scmp.ne.s32.totalorder %s3345_s8, %s2398_s26  ;;  %p2405_p10 = scmp.lt.u32.totalorder %s2398_s26, %s3345_s8 }
  0x2c   : > { %p2401_p1 = pnand %p2399_p2, %p2372_p13 }
  0x2e   : > { %p2402_p6 = pneg %p2401_p1 }
  0x30   : > { %p2407_p3 = pnand %p2405_p10, %p2402_p6 }
  0x32   : > { %2410 = shalt.err (!%p2407_p3)
}
  0x33   : > { %s2411_s27 = scalar_lea.vmem %s2655_s30, 4096  ;;  %p2419_p12 = scmp.lt.s32.totalorder %s2655_s30, %s2655_s30 }
  0x34   : > { %p2412_p5 = scmp.ne.s32.totalorder %s2655_s30, %s2411_s27  ;;  %p2420_p0 = scmp.lt.s32.totalorder %s2411_s27, %s2411_s27 }
  0x36   : > { %p2414_p7 = pnand %p2412_p5, %p2372_p13  ;;  %p2421_p2 = por %p2420_p0, %p2419_p12 }
  0x38   : > { %p2415_p9 = pneg %p2414_p7 }
  0x3a   : > { %p2422_p1 = pnand %p2421_p2, %p2415_p9 }
  0x3c   : > { %2425 = shalt.err (!%p2422_p1)
}
  0x3d   : > { %s3353_s10 = smov 256   ;;  %s3354_s17 = smov 16  }
  0x3e   : > { %2153 = dma.hbm_to_vmem [thread:$0]  (!%p2651_p11), %s3345_s8, 4096, %s2655_s30, [#allocation6], %s3353_s10, %s3353_s10, %s3354_s17  }
  0x3f   : > { %s2713_s13 = sadd.s32 1, %s2526_s20   ;;  %s36_s15 = sadd.s32 1, %s2522_s19 }
  0x40   : > { %s33_s14 = ssub.s32 %s2526_s20, %s2713_s13  ;;  %p43_p6 = scmp.ne.s32.totalorder %s2522_s19, %s2518_s18 }
  0x41   : > { %p34_p13 = scmp.eq.s32.totalorder %s33_s14, 0  ;;  %p44_p10 = scmp.eq.s32.totalorder %s2526_s20, 0 }
  0x42   : > { %p3365_p5 = scmp.eq.s32.totalorder %s2621_s21, 1  ;;  %p2164_p9 = scmp.lt.s32.totalorder %s2526_s20, 2 }
  0x43   : > { %s2722_s16 = scalar_select %p34_p13, %s2522_s19, %s36_s15  }
  0x44   : > { %p45_p3 = por %p44_p10, %p43_p6  ;;  %p2726_p7 = por %p3365_p5, %p43_p6 }
  0x45   : > { %s363_s22 = sand.u32 1, %s2522_s19   ;;  %s1772_s30 = sshll.u32 %s2526_s20, 12 }
  0x46   : > { %s3366_s28 = scalar_select %p2726_p7, 1, 0 }
  0x47   : > { %s1733_s26 = sshll.u32 %s363_s22, 8  ;;  %s2736_s24 = scalar_lea.hbm %s3337_s0, %s1772_s30 }
  0x48   : > { %s367_s12 = scalar_lea.vmem [#allocation2], %s1733_s26  ;;  %p2740_p11 = pnand %p2164_p9, %p45_p3 }
  0x49   : > { %s375_s14 = sshll.u32 %s367_s12, 4  ;;  %s2744_s10 = scalar_lea.sflag [#allocation3], %s363_s22  ;;  %s2738_s14 = int_to_ptr.vmem [resolvable:$true] %s375_s14 }
  0x4a   : > { %s2426_s17 = scalar_lea.hbm %s2736_s24, 4096  ;;  %p2428_p0 = pneg %p2740_p11 }
  0x4b   : > { %p2427_p12 = scmp.ne.s32.totalorder %s2736_s24, %s2426_s17  ;;  %s2431_s29 = scalar_lea.hbm %s3337_s0, 8192 }
  0x4c   : > { %p2432_p13 = scmp.lt.u32.totalorder %s2736_s24, %s3337_s0  ;;  %p2433_p6 = scmp.lt.u32.totalorder %s2431_s29, %s2426_s17 }
  0x4d   : > { %p2429_p2 = pnand %p2428_p0, %p2427_p12  ;;  %p2435_p3 = scmp.lt.u32.totalorder %s2426_s17, %s2736_s24 }
  0x4e   : > { %p2434_p10 = por %p2433_p6, %p2432_p13 }
  0x4f   : > { %p2430_p1 = pneg %p2429_p2 }
  0x50   : > { %p2436_p5 = por %p2435_p3, %p2434_p10 }
  0x52   : > { %p2437_p9 = pnand %p2436_p5, %p2430_p1 }
  0x54   : > { %2440 = shalt.err (!%p2437_p9)
}
  0x55   : > { %s2441_s22 = scalar_lea.vmem %s2738_s14, 4096  ;;  %s2534_s26 = smov [#allocation2]  }
  0x56   : > { %p2442_p12 = scmp.ne.s32.totalorder %s2738_s14, %s2441_s22  ;;  %s2446_s30 = sshll.u32 %s2534_s26, 4  ;;  %s2447_s30 = int_to_ptr.vmem [resolvable:$false] %s2446_s30 }
  0x57   : > { %s2448_s27 = scalar_lea.vmem %s2447_s30, 8192  ;;  %p2449_p4 = scmp.lt.s32.totalorder %s2738_s14, %s2447_s30 }
  0x58   : > { %p2444_p2 = pnand %p2442_p12, %p2428_p0  ;;  %p2450_p13 = scmp.lt.s32.totalorder %s2448_s27, %s2441_s22 }
  0x5a   : > { %p2445_p7 = pneg %p2444_p2  ;;  %p2451_p6 = por %p2450_p13, %p2449_p4 }
  0x5c   : > { %p2452_p10 = pnand %p2451_p6, %p2445_p7 }
  0x5e   : > { %2455 = shalt.err (!%p2452_p10)
}
  0x5f   : > { %s3368_s17 = smov 16   ;;  %s3369_s29 = smov 256  }
  0x60   : > { %2157 = dma.hbm_to_vmem [thread:$0]  (!%p2740_p11), %s2736_s24, 4096, %s2738_s14, %s2744_s10, %s3369_s29, %s3369_s29, %s3368_s17  }
  0x61   : > { %396 = sbr.rel (%p2640_p8) target bundleno = 1257 (0x4e9), region = 60  ;;  %s2778_s12 = sand.u32 (!%p2640_p8), 1, %s2518_s18  }
  0x62   : > { %s3357_s22 = sshll.u32 (!%p2640_p8), %s2778_s12, 8  ;;  %s399_s26 = scalar_lea.sflag (!%p2640_p8), [#allocation3], %s2778_s12 }
  0x63   : > { %s2784_s15 = scalar_lea.vmem (!%p2640_p8), [#allocation2], %s3357_s22  ;;  %p3370_p4 = scmp.ne.s32.totalorder (!%p2640_p8), %s3360_s23, 0 }
  0x68   : > { %2501 = dma.done.wait (%p3370_p4), %s399_s26, 4096  }
  0x69   : > { %2503 = vsyncadd (%p3370_p4), %s399_s26, 4294963200  ;;  %p3371_p7 = scmp.eq.s32.totalorder %s2621_s21, 0 }
  0x6b   : > { %2505 = dma.done.wait (%p3371_p7), [#allocation6], 5120   ;;  %p3372_p8 = pmov %p3371_p7 }
  0x6c   : > { %v537_v0 = vld [vmem:[%s3339_s2 + $0x80] sm:$0xff]  ;;  %v538_v1 = vld [vmem:[%s3339_s2 + $0x88] sm:$0xff]  ;;  %v539_v5 = vld [vmem:[%s3339_s2 + $0x90] sm:$0xff]  ;;  %s1742_s29 = sshll.u32 %s2621_s21, 4  ;;  %s2535_s30 = smov 64   ;;  %vm1048_vm0 = vcmask 523264  }
  0x6d   : > { %2507 = vsyncadd (%p3372_p8), [#allocation6], 4294962176  ;;  %v521_v2 = vld [vmem:[%s3339_s2] sm:$0xff]  ;;  %v2007_v3 = vpack.c.bf16 %v538_v1, %v537_v0  ;;  %v522_v4 = vld [vmem:[%s3339_s2 + $0x8] sm:$0xff]  ;;  %p461_p11 = scmp.lt.s32.totalorder %s1742_s29, 31  ;;  %s3373_s25 = sshll.u32 %s2778_s12, 8 }
  0x6e   : > { %v540_v6 = vld [vmem:[%s3339_s2 + $0x98] sm:$0xff]  ;;  %v2009_v7 = vpack.c.bf16 %v522_v4, %v521_v2  ;;  %v523_v9 = vld [vmem:[%s3339_s2 + $0x10] sm:$0xff]  ;;  %v541_v11 = vld [vmem:[%s3339_s2 + $0xa0] sm:$0xff]  ;;  %s3228_s10 = scalar_lea.vmem [#allocation8], %s3373_s25  ;;  %s1774_s24 = sshll.u32 %s2621_s21, 12 }
  0x6f   : > { %v2011_v8 = vpack.c.bf16 %v540_v6, %v539_v5  ;;  %v524_v10 = vld [vmem:[%s3339_s2 + $0x18] sm:$0xff]  ;;  %2008 = vmatprep.subr.bf16.mxu0 %v2007_v3  ;;  %v542_v12 = vld [vmem:[%s3339_s2 + $0xa8] sm:$0xff]  ;;  %2119 = vmatprep.subr.bf16.mxu1 %v2007_v3  ;;  %v525_v15 = vld [vmem:[%s3339_s2 + $0x20] sm:$0xff]  ;;  %s3385_s29 = smov (!%p461_p11, %s1742_s29), 31  ;;  %s3374_s23 = sld [smem:[#allocation14_spill]] }
  0x70   : > { %2010 = vmatpush3.bf16.msra.mxu0 %v2009_v7  ;;  %v2013_v13 = vpack.c.bf16 %v524_v10, %v523_v9  ;;  %2127 = vmatpush3.bf16.msra.mxu1 %v2009_v7  ;;  %v2015_v14 = vpack.c.bf16 %v542_v12, %v541_v11  ;;  %v526_v16 = vld [vmem:[%s3339_s2 + $0x28] sm:$0xff]  ;;  %v543_v17 = vld [vmem:[%s3339_s2 + $0xb0] sm:$0xff]  ;;  %v544_v18 = vld [vmem:[%s3339_s2 + $0xb8] sm:$0xff]  ;;  %s1743_s22 = sshll.u32 %s3385_s29, 3  ;;  %s1576_s17 = scalar_lea.sflag [#allocation4], %s2778_s12 }
  0x71   : > { %2012 = vmatprep.subr.bf16.mxu0 %v2011_v8  ;;  %2120 = vmatprep.subr.bf16.mxu1 %v2011_v8  ;;  %v2017_v19 = vpack.c.bf16 %v526_v16, %v525_v15  ;;  %v2019_v20 = vpack.c.bf16 %v544_v18, %v543_v17  ;;  %v527_v21 = vld [vmem:[%s3339_s2 + $0x30] sm:$0xff]  ;;  %v528_v22 = vld [vmem:[%s3339_s2 + $0x38] sm:$0xff]  ;;  %v545_v23 = vld [vmem:[%s3339_s2 + $0xc0] sm:$0xff]  ;;  %s3005_s14 = scalar_lea.vmem %s3348_s11, %s1743_s22  ;;  %p3375_p1 = scmp.ne.s32.totalorder %s3366_s28, 0 }
  0x72   : > { %v546_v24 = vld [vmem:[%s3339_s2 + $0xc8] sm:$0xff]  ;;  %v2021_v26 = vpack.c.bf16 %v528_v22, %v527_v21  ;;  %v529_v28 = vld [vmem:[%s3339_s2 + $0x40] sm:$0xff]  ;;  %v547_v31 = vld [vmem:[%s3339_s2 + $0xd0] sm:$0xff]  ;;  %s2537_s29 = smov [#allocation8]  }
  0x73   : > { %v474_v25 = vld [vmem:[%s2784_s15 + $0x8] sm:$0xff]  ;;  %v2023_v27 = vpack.c.bf16 %v546_v24, %v545_v23  ;;  %v548_v32 = vld [vmem:[%s3339_s2 + $0xd8] sm:$0xff]  ;;  %v531_v35 = vld [vmem:[%s3339_s2 + $0x50] sm:$0xff] }
  0x74   : > { %2014 = vmatpush3.bf16.msra.mxu0 %v2013_v13  ;;  %2128 = vmatpush3.bf16.msra.mxu1 %v2013_v13  ;;  %v530_v29 = vld [vmem:[%s3339_s2 + $0x48] sm:$0xff]  ;;  %v2027_v34 = vpack.c.bf16 %v548_v32, %v547_v31  ;;  %v532_v36 = vld [vmem:[%s3339_s2 + $0x58] sm:$0xff]  ;;  %v549_v37 = vld [vmem:[%s3339_s2 + $0xe0] sm:$0xff] }
  0x75   : > { %2016 = vmatprep.subr.bf16.mxu0 %v2015_v14  ;;  %2121 = vmatprep.subr.bf16.mxu1 %v2015_v14  ;;  %v490_v30 = vld [vmem:[%s2784_s15 + $0x88] sm:$0xff]  ;;  %v2025_v33 = vpack.c.bf16 %v530_v29, %v529_v28  ;;  %v2029_v39 = vpack.c.bf16 %v532_v36, %v531_v35  ;;  %v533_v41 = vld [vmem:[%s3339_s2 + $0x60] sm:$0xff]  ;;  %v551_v43 = vld [vmem:[%s3339_s2 + $0xf0] sm:$0xff] }
  0x76   : > { %624 = vmatprep.mubr.f32.mxu0 %v474_v25  ;;  %664 = vmatprep.mubr.f32.mxu1 %v490_v30  ;;  %v550_v38 = vld [vmem:[%s3339_s2 + $0xe8] sm:$0xff]  ;;  %v552_v44 = vld [vmem:[%s3339_s2 + $0xf8] sm:$0xff]  ;;  %v535_v47 = vld [vmem:[%s3339_s2 + $0x70] sm:$0xff] }
  0x77   : > { %v2031_v40 = vpack.c.bf16 %v550_v38, %v549_v37  ;;  %v534_v42 = vld [vmem:[%s3339_s2 + $0x68] sm:$0xff]  ;;  %v2035_v46 = vpack.c.bf16 %v552_v44, %v551_v43  ;;  %v536_v48 = vld [vmem:[%s3339_s2 + $0x78] sm:$0xff]  ;;  %v721_v49 = vld [vmem:[%s3341_s4] sm:$0xff] }
  0x78   : > { %2018 = vmatpush3.bf16.msra.mxu0 %v2017_v19  ;;  %2129 = vmatpush3.bf16.msra.mxu1 %v2017_v19  ;;  %v2033_v45 = vpack.c.bf16 %v534_v42, %v533_v41  ;;  %v722_v50 = vld [vmem:[%s3341_s4 + $0x8] sm:$0xff]  ;;  %v2037_v51 = vpack.c.bf16 %v536_v48, %v535_v47  ;;  %v723_v53 = vld [vmem:[%s3341_s4 + $0x10] sm:$0xff]  ;;  %v724_v54 = vld [vmem:[%s3341_s4 + $0x18] sm:$0xff] }
  0x79   : > { %2020 = vmatprep.subr.bf16.mxu0 %v2019_v20  ;;  %2122 = vmatprep.subr.bf16.mxu1 %v2019_v20  ;;  %v2039_v52 = vpack.c.bf16 %v722_v50, %v721_v49  ;;  %v473_v55 = vld [vmem:[%s2784_s15] sm:$0xff]  ;;  %v476_v57 = vld [vmem:[%s2784_s15 + $0x18] sm:$0xff]  ;;  %v2043_v59 = vpack.c.bf16 %v724_v54, %v723_v53  ;;  %v726_v61 = vld [vmem:[%s3341_s4 + $0x28] sm:$0xff] }
  0x7a   : > { %v489_v56 = vld [vmem:[%s2784_s15 + $0x80] sm:$0xff]  ;;  %v492_v58 = vld [vmem:[%s2784_s15 + $0x98] sm:$0xff]  ;;  %v475_v62 = vld [vmem:[%s2784_s15 + $0x10] sm:$0xff] }
  0x7b   : > { %v725_v60 = vld [vmem:[%s3341_s4 + $0x20] sm:$0xff]  ;;  %v491_v63 = vld [vmem:[%s2784_s15 + $0x90] sm:$0xff]  ;;  %v478_v0 = vld [vmem:[%s2784_s15 + $0x28] sm:$0xff] }
  0x7c   : > { %2022 = vmatpush3.bf16.msra.mxu0 %v2021_v26  ;;  %2130 = vmatpush3.bf16.msra.mxu1 %v2021_v26  ;;  %v494_v1 = vld [vmem:[%s2784_s15 + $0xa8] sm:$0xff]  ;;  %v2047_v2 = vpack.c.bf16 %v726_v61, %v725_v60  ;;  %v477_v3 = vld [vmem:[%s2784_s15 + $0x20] sm:$0xff]  ;;  %v480_v5 = vld [vmem:[%s2784_s15 + $0x38] sm:$0xff] }
  0x7d   : > { %2024 = vmatprep.subr.bf16.mxu0 %v2023_v27  ;;  %2123 = vmatprep.subr.bf16.mxu1 %v2023_v27  ;;  %v493_v4 = vld [vmem:[%s2784_s15 + $0xa0] sm:$0xff]  ;;  %v496_v6 = vld [vmem:[%s2784_s15 + $0xb8] sm:$0xff]  ;;  %v479_v7 = vld [vmem:[%s2784_s15 + $0x30] sm:$0xff] }
  0x7e   : > { %v495_v8 = vld [vmem:[%s2784_s15 + $0xb0] sm:$0xff]  ;;  %v482_v9 = vld [vmem:[%s2784_s15 + $0x48] sm:$0xff]  ;;  %v481_v11 = vld [vmem:[%s2784_s15 + $0x40] sm:$0xff] }
  0x7f   : > { %v498_v10 = vld [vmem:[%s2784_s15 + $0xc8] sm:$0xff]  ;;  %v497_v12 = vld [vmem:[%s2784_s15 + $0xc0] sm:$0xff]  ;;  %v484_v13 = vld [vmem:[%s2784_s15 + $0x58] sm:$0xff] }
  0x80   : > { %2026 = vmatpush3.bf16.msra.mxu0 %v2025_v33  ;;  %2131 = vmatpush3.bf16.msra.mxu1 %v2025_v33  ;;  %v500_v14 = vld [vmem:[%s2784_s15 + $0xd8] sm:$0xff]  ;;  %v483_v15 = vld [vmem:[%s2784_s15 + $0x50] sm:$0xff]  ;;  %v486_v17 = vld [vmem:[%s2784_s15 + $0x68] sm:$0xff] }
  0x81   : > { %2028 = vmatprep.subr.bf16.mxu0 %v2027_v34  ;;  %2124 = vmatprep.subr.bf16.mxu1 %v2027_v34  ;;  %v499_v16 = vld [vmem:[%s2784_s15 + $0xd0] sm:$0xff]  ;;  %v502_v18 = vld [vmem:[%s2784_s15 + $0xe8] sm:$0xff]  ;;  %v485_v19 = vld [vmem:[%s2784_s15 + $0x60] sm:$0xff] }
  0x82   : > { %v501_v20 = vld [vmem:[%s2784_s15 + $0xe0] sm:$0xff]  ;;  %v488_v21 = vld [vmem:[%s2784_s15 + $0x78] sm:$0xff]  ;;  %v487_v23 = vld [vmem:[%s2784_s15 + $0x70] sm:$0xff] }
  0x83   : > { %v504_v22 = vld [vmem:[%s2784_s15 + $0xf8] sm:$0xff]  ;;  %v503_v24 = vld [vmem:[%s2784_s15 + $0xf0] sm:$0xff]  ;;  %v729_v28 = vld [vmem:[%s3341_s4 + $0x40] sm:$0xff]  ;;  %s3124_s15 = scalar_lea.vmem %s3338_s1, %s1743_s22  ;;  %s2460_s22 = sshll.u32 %s2537_s29, 4  ;;  %s2461_s22 = int_to_ptr.vmem [resolvable:$false] %s2460_s22 }
  0x84   : > { %2030 = vmatpush3.bf16.msra.mxu0 %v2029_v39  ;;  %2132 = vmatpush3.bf16.msra.mxu1 %v2029_v39  ;;  %v727_v25 = vld [vmem:[%s3341_s4 + $0x30] sm:$0xff]  ;;  %v728_v26 = vld [vmem:[%s3341_s4 + $0x38] sm:$0xff]  ;;  %v730_v29 = vld [vmem:[%s3341_s4 + $0x48] sm:$0xff]  ;;  %s2462_s26 = scalar_lea.vmem %s2461_s22, 8192 }
  0x85   : > { %2032 = vmatprep.subr.bf16.mxu0 %v2031_v40  ;;  %2125 = vmatprep.subr.bf16.mxu1 %v2031_v40  ;;  %v2051_v27 = vpack.c.bf16 %v728_v26, %v727_v25  ;;  %v2055_v30 = vpack.c.bf16 %v730_v29, %v729_v28  ;;  %v731_v31 = vld [vmem:[%s3341_s4 + $0x50] sm:$0xff]  ;;  %v732_v32 = vld [vmem:[%s3341_s4 + $0x58] sm:$0xff]  ;;  %v733_v34 = vld [vmem:[%s3341_s4 + $0x60] sm:$0xff] }
  0x86   : > { %v2059_v33 = vpack.c.bf16 %v732_v32, %v731_v31  ;;  %v734_v35 = vld [vmem:[%s3341_s4 + $0x68] sm:$0xff]  ;;  %v735_v37 = vld [vmem:[%s3341_s4 + $0x70] sm:$0xff]  ;;  %v736_v38 = vld [vmem:[%s3341_s4 + $0x78] sm:$0xff] }
  0x87   : > { %v2063_v36 = vpack.c.bf16 %v734_v35, %v733_v34  ;;  %v2067_v39 = vpack.c.bf16 %v736_v38, %v735_v37  ;;  %v2973_v42 = vld [vmem:[%s3340_s3] ss:$0 sm:$0xff] }
  0x88   : > { %2034 = vmatpush3.bf16.msra.mxu0 %v2033_v45  ;;  %2133 = vmatpush3.bf16.msra.mxu1 %v2033_v45 }
  0x89   : > { %2036 = vmatprep.subr.bf16.mxu0 %v2035_v46  ;;  %2126 = vmatprep.subr.bf16.mxu1 %v2035_v46 }
  0x8c   : > { %2038 = vmatpush3.bf16.msra.mxu0 %v2037_v51  ;;  %2134 = vmatpush3.bf16.msra.mxu1 %v2037_v51 }
  0x8d   : > { %2040 = vmatprep.subr.bf16.mxu1 %v2039_v52 }
  0x8f   : > { %625 = vmatmul.mubr.f32.vlgmr.msra.gmra.mrb[0].mxu0 %v473_v55  ;;  %665 = vmatmul.mubr.f32.vlgmr.msra.gmra.mrb[0].mxu1 %v489_v56 }
  0x90   : > { %629 = vmatprep.mubr.f32.mxu0 %v476_v57  ;;  %669 = vmatprep.mubr.f32.mxu1 %v492_v58 }
  0x91   : > { %2042 = vmatpush3.bf16.msra.mxu1 %v2039_v52 }
  0x92   : > { %2044 = vmatprep.subr.bf16.mxu1 %v2043_v59 }
  0x93   : > { %630 = vmatmul.mubr.f32.gmra.mrb[2].mxu0 %v475_v62  ;;  %670 = vmatmul.mubr.f32.gmra.mrb[2].mxu1 %v491_v63 }
  0x94   : > { %634 = vmatprep.mubr.f32.mxu0 %v478_v0  ;;  %674 = vmatprep.mubr.f32.mxu1 %v494_v1 }
  0x95   : > { %2046 = vmatpush3.bf16.msra.mxu1 %v2043_v59 }
  0x96   : > { %2048 = vmatprep.subr.bf16.mxu1 %v2047_v2 }
  0x97   : > { %635 = vmatmul.mubr.f32.gmra.mrb[4].mxu0 %v477_v3  ;;  %675 = vmatmul.mubr.f32.gmra.mrb[4].mxu1 %v493_v4 }
  0x98   : > { %639 = vmatprep.mubr.f32.mxu0 %v480_v5  ;;  %679 = vmatprep.mubr.f32.mxu1 %v496_v6 }
  0x99   : > { %2050 = vmatpush3.bf16.msra.mxu1 %v2047_v2 }
  0x9a   : > { %2052 = vmatprep.subr.bf16.mxu1 %v2051_v27 }
  0x9b   : > { %640 = vmatmul.mubr.f32.gmra.mrb[6].mxu0 %v479_v7  ;;  %680 = vmatmul.mubr.f32.gmra.mrb[6].mxu1 %v495_v8 }
  0x9c   : > { %644 = vmatprep.mubr.f32.mxu0 %v482_v9  ;;  %684 = vmatprep.mubr.f32.mxu1 %v498_v10 }
  0x9d   : > { %2054 = vmatpush3.bf16.msra.mxu1 %v2051_v27 }
  0x9e   : > { %2056 = vmatprep.subr.bf16.mxu1 %v2055_v30 }
  0x9f   : > { %645 = vmatmul.mubr.f32.gmra.mrb[8].mxu0 %v481_v11  ;;  %685 = vmatmul.mubr.f32.gmra.mrb[8].mxu1 %v497_v12 }
  0xa0   : > { %649 = vmatprep.mubr.f32.mxu0 %v484_v13  ;;  %689 = vmatprep.mubr.f32.mxu1 %v500_v14 }
  0xa1   : > { %2058 = vmatpush3.bf16.msra.mxu1 %v2055_v30 }
  0xa2   : > { %2060 = vmatprep.subr.bf16.mxu1 %v2059_v33 }
  0xa3   : > { %650 = vmatmul.mubr.f32.gmra.mrb[10].mxu0 %v483_v15  ;;  %690 = vmatmul.mubr.f32.gmra.mrb[10].mxu1 %v499_v16 }
  0xa4   : > { %654 = vmatprep.mubr.f32.mxu0 %v486_v17  ;;  %694 = vmatprep.mubr.f32.mxu1 %v502_v18 }
  0xa5   : > { %2062 = vmatpush3.bf16.msra.mxu1 %v2059_v33 }
  0xa6   : > { %2064 = vmatprep.subr.bf16.mxu1 %v2063_v36 }
  0xa7   : > { %655 = vmatmul.mubr.f32.gmra.mrb[12].mxu0 %v485_v19  ;;  %695 = vmatmul.mubr.f32.gmra.mrb[12].mxu1 %v501_v20 }
  0xa8   : > { %659 = vmatprep.mubr.f32.mxu0 %v488_v21  ;;  %699 = vmatprep.mubr.f32.mxu1 %v504_v22 }
  0xa9   : > { %2066 = vmatpush3.bf16.msra.mxu1 %v2063_v36 }
  0xaa   : > { %2068 = vmatprep.subr.bf16.mxu1 %v2067_v39 }
  0xab   : > { %660 = vmatmul.mubr.f32.gmra.mrb[14].mxu0 %v487_v23  ;;  %700 = vmatmul.mubr.f32.gmra.mrb[14].mxu1 %v503_v24 }
  0xad   : > { %2070 = vmatpush3.bf16.msra.mxu1 %v2067_v39 }
 0x162   : > { %v1807_v40 = vpop.f32.mrb[0].mxu0  ;;  %v1831_v41 = vpop.f32.mrb[0].mxu1 }
 0x163   : > { %v1808_v43 = vpop.f32.mrb[1].mxu0  ;;  %v1832_v44 = vpop.f32.mrb[1].mxu1 }
 0x164   : > { %v1809_v45 = vadd.f32 %v1808_v43, %v1807_v40  ;;  %v1833_v46 = vadd.f32 %v1832_v44, %v1831_v41 }
 0x166   : > { %v627_v47 = vadd.f32 %v1809_v45, %v2973_v42  ;;  %v1810_v48 = vpop.f32.mrb[2].mxu0  ;;  %v1834_v49 = vpop.f32.mrb[2].mxu1  ;;  %v667_v33 = vadd.f32 %v1833_v46, %v2973_v42 }
 0x167   : > { %v1811_v50 = vpop.f32.mrb[3].mxu0  ;;  %v1835_v51 = vpop.f32.mrb[3].mxu1 }
 0x168   : > { %2210 = vtanh.f32 %v627_v47  ;;  %v1812_v52 = vadd.f32 %v1811_v50, %v1810_v48  ;;  %v1836_v53 = vadd.f32 %v1835_v51, %v1834_v49 }
 0x16a   : > { %v632_v54 = vadd.f32 %v1812_v52, %v2973_v42  ;;  %v1813_v55 = vpop.f32.mrb[4].mxu0  ;;  %v1837_v56 = vpop.f32.mrb[4].mxu1  ;;  %v672_v39 = vadd.f32 %v1836_v53, %v2973_v42 }
 0x16b   : > { %v1814_v57 = vpop.f32.mrb[5].mxu0  ;;  %v1838_v58 = vpop.f32.mrb[5].mxu1 }
 0x16c   : > { %2212 = vtanh.f32 %v632_v54  ;;  %v1815_v59 = vadd.f32 %v1814_v57, %v1813_v55  ;;  %v1839_v60 = vadd.f32 %v1838_v58, %v1837_v56  ;;  %v1033_v58 = vld [vmem:[#allocation5] sm:$0xff] }
 0x16e   : > { %v637_v61 = vadd.f32 %v1815_v59, %v2973_v42  ;;  %v1816_v62 = vpop.f32.mrb[6].mxu0  ;;  %v1840_v63 = vpop.f32.mrb[6].mxu1  ;;  %v677_v40 = vadd.f32 %v1839_v60, %v2973_v42  ;;  %v1035_v59 = vld [vmem:[#allocation5 + $0x10] sm:$0xff] }
 0x16f   : > { %v1817_v0 = vpop.f32.mrb[7].mxu0  ;;  %v1841_v1 = vpop.f32.mrb[7].mxu1 }
 0x170   : > { %2214 = vtanh.f32 %v637_v61  ;;  %v1818_v2 = vadd.f32 %v1817_v0, %v1816_v62  ;;  %v1842_v3 = vadd.f32 %v1841_v1, %v1840_v63  ;;  %v1036_v61 = vld [vmem:[#allocation5 + $0x18] sm:$0xff]  ;;  %v1037_v63 = vld [vmem:[#allocation5 + $0x20] sm:$0xff]  ;;  %v1038_v0 = vld [vmem:[#allocation5 + $0x28] sm:$0xff] }
 0x171   : > { %v2075_v62 = vpack.c.bf16 %v1036_v61, %v1035_v59  ;;  %v2079_v1 = vpack.c.bf16 %v1038_v0, %v1037_v63 }
 0x172   : > { %v2211_v4 = vpop.eup %2210  ;;  %v642_v5 = vadd.f32 %v1818_v2, %v2973_v42  ;;  %v1819_v6 = vpop.f32.mrb[8].mxu0  ;;  %v682_v43 = vadd.f32 %v1842_v3, %v2973_v42  ;;  %v1039_v2 = vld [vmem:[#allocation5 + $0x30] sm:$0xff]  ;;  %v1040_v3 = vld [vmem:[#allocation5 + $0x38] sm:$0xff] }
 0x173   : > { %v1843_v7 = vpop.f32.mrb[8].mxu1  ;;  %1943 = vmatprep.mubr.f32.mxu1 %v2211_v4  ;;  %v1820_v8 = vpop.f32.mrb[9].mxu0  ;;  %v2083_v4 = vpack.c.bf16 %v1040_v3, %v1039_v2 }
 0x174   : > { %v1844_v9 = vpop.f32.mrb[9].mxu1  ;;  %2216 = vtanh.f32 %v642_v5  ;;  %v1821_v10 = vadd.f32 %v1820_v8, %v1819_v6  ;;  %v2998_v5 = vld [vmem:[%s3342_s5] ss:$0 sm:$0xff] }
 0x175   : > { %v1845_v11 = vadd.f32 %v1844_v9, %v1843_v7 }
 0x176   : > { %v2213_v12 = vpop.eup %2212  ;;  %v647_v13 = vadd.f32 %v1821_v10, %v2973_v42  ;;  %v1822_v14 = vpop.f32.mrb[10].mxu0 }
 0x177   : > { %v1846_v15 = vpop.f32.mrb[10].mxu1  ;;  %v1823_v16 = vpop.f32.mrb[11].mxu0  ;;  %1944 = vmatmul.mubr.f32.vlgmr.msra.gmra.mrb[16].mxu1 %v2213_v12  ;;  %v687_v44 = vadd.f32 %v1845_v11, %v2973_v42 }
 0x178   : > { %v1847_v17 = vpop.f32.mrb[11].mxu1  ;;  %2218 = vtanh.f32 %v647_v13  ;;  %v1824_v18 = vadd.f32 %v1823_v16, %v1822_v14 }
 0x179   : > { %v1848_v19 = vadd.f32 %v1847_v17, %v1846_v15 }
 0x17a   : > { %v2215_v20 = vpop.eup %2214  ;;  %v652_v21 = vadd.f32 %v1824_v18, %v2973_v42  ;;  %v1825_v22 = vpop.f32.mrb[12].mxu0 }
 0x17b   : > { %v1849_v23 = vpop.f32.mrb[12].mxu1  ;;  %1946 = vmatprep.mubr.f32.mxu1 %v2215_v20  ;;  %v1826_v24 = vpop.f32.mrb[13].mxu0  ;;  %v692_v46 = vadd.f32 %v1848_v19, %v2973_v42 }
 0x17c   : > { %v1850_v25 = vpop.f32.mrb[13].mxu1  ;;  %2220 = vtanh.f32 %v652_v21  ;;  %v1827_v26 = vadd.f32 %v1826_v24, %v1825_v22 }
 0x17d   : > { %v1851_v27 = vadd.f32 %v1850_v25, %v1849_v23 }
 0x17e   : > { %v2217_v28 = vpop.eup %2216  ;;  %v657_v29 = vadd.f32 %v1827_v26, %v2973_v42  ;;  %v1828_v30 = vpop.f32.mrb[14].mxu0 }
 0x17f   : > { %v1852_v31 = vpop.f32.mrb[14].mxu1  ;;  %v1829_v32 = vpop.f32.mrb[15].mxu0  ;;  %1947 = vmatmul.mubr.f32.gmra.mrb[18].mxu1 %v2217_v28  ;;  %v697_v47 = vadd.f32 %v1851_v27, %v2973_v42 }
 0x180   : > { %v1853_v34 = vpop.f32.mrb[15].mxu1  ;;  %2222 = vtanh.f32 %v657_v29  ;;  %v1830_v35 = vadd.f32 %v1829_v32, %v1828_v30 }
 0x181   : > { %v1854_v36 = vadd.f32 %v1853_v34, %v1852_v31  ;;  %2224 = vtanh.f32 %v667_v33 }
 0x182   : > { %v2219_v37 = vpop.eup %2218  ;;  %v662_v38 = vadd.f32 %v1830_v35, %v2973_v42 }
 0x183   : > { %1949 = vmatprep.mubr.f32.mxu1 %v2219_v37  ;;  %v702_v50 = vadd.f32 %v1854_v36, %v2973_v42  ;;  %v1034_v42 = vld [vmem:[#allocation5 + $0x8] sm:$0xff] }
 0x184   : > { %2226 = vtanh.f32 %v662_v38  ;;  %v2071_v60 = vpack.c.bf16 %v1034_v42, %v1033_v58 }
 0x185   : > { %2228 = vtanh.f32 %v672_v39 }
 0x186   : > { %v2221_v41 = vpop.eup %2220  ;;  %2230 = vtanh.f32 %v677_v40  ;;  %2072 = vmatprep.subr.bf16.mxu1 %v2071_v60 }
 0x187   : > { %1950 = vmatmul.mubr.f32.gmra.mrb[20].mxu1 %v2221_v41  ;;  %2232 = vtanh.f32 %v682_v43 }
 0x188   : > { %2234 = vtanh.f32 %v687_v44  ;;  %2074 = vmatpush3.bf16.msra.mxu1 %v2071_v60 }
 0x189   : > { %2236 = vtanh.f32 %v692_v46  ;;  %2076 = vmatprep.subr.bf16.mxu1 %v2075_v62 }
 0x18a   : > { %v2223_v45 = vpop.eup %2222  ;;  %2238 = vtanh.f32 %v697_v47 }
 0x18b   : > { %1952 = vmatprep.mubr.f32.mxu1 %v2223_v45  ;;  %v2225_v48 = vpop.eup %2224  ;;  %2240 = vtanh.f32 %v702_v50 }
 0x18c   : > { %2078 = vmatpush3.bf16.msra.mxu1 %v2075_v62 }
 0x18d   : > { %2080 = vmatprep.subr.bf16.mxu1 %v2079_v1 }
 0x18e   : > { %v2227_v49 = vpop.eup %2226 }
 0x18f   : > { %1953 = vmatmul.mubr.f32.gmra.mrb[22].mxu1 %v2227_v49  ;;  %v2229_v51 = vpop.eup %2228 }
 0x190   : > { %1955 = vmatprep.mubr.f32.mxu1 %v2225_v48  ;;  %v2231_v52 = vpop.eup %2230  ;;  %2082 = vmatpush3.bf16.msra.mxu1 %v2079_v1 }
 0x191   : > { %v2233_v53 = vpop.eup %2232  ;;  %2084 = vmatprep.subr.bf16.mxu1 %v2083_v4 }
 0x192   : > { %v2235_v54 = vpop.eup %2234 }
 0x193   : > { %1956 = vmatmul.mubr.f32.gmra.mrb[24].mxu1 %v2229_v51  ;;  %v2237_v55 = vpop.eup %2236 }
 0x194   : > { %1958 = vmatprep.mubr.f32.mxu1 %v2231_v52  ;;  %v2239_v56 = vpop.eup %2238  ;;  %2086 = vmatpush3.bf16.msra.mxu1 %v2083_v4 }
 0x195   : > { %v2241_v57 = vpop.eup %2240 }
 0x197   : > { %1959 = vmatmul.mubr.f32.gmra.mrb[26].mxu1 %v2233_v53 }
 0x198   : > { %1961 = vmatprep.mubr.f32.mxu1 %v2235_v54 }
 0x19b   : > { %1962 = vmatmul.mubr.f32.gmra.mrb[28].mxu1 %v2237_v55 }
 0x19c   : > { %1964 = vmatprep.mubr.f32.mxu1 %v2239_v56 }
 0x19f   : > { %1965 = vmatmul.mubr.f32.gmra.mrb[30].mxu1 %v2241_v57 }
 0x24a   : > { %v1945_v6 = vpop.f32.mrb[16].mxu1 }
 0x24b   : > { %v3008_v7 = vadd.f32 %v1945_v6, %v2998_v5  ;;  %v810_v8 = vpop.f32.mrb[17].mxu1 }
 0x24c   : > { %v3011_v9 = vadd.f32 %v2998_v5, %v810_v8 }
 0x24d   : > { %1560 = vst [vmem:[%s3005_s14 + $0x8] sm:$0xff] %v3008_v7  ;;  %v890_v10 = vmul.f32 0.5, %v3008_v7 }
 0x24e   : > { %v889_v11 = vmul.f32 0.5, %v3011_v9  ;;  %1559 = vst [vmem:[%s3005_s14] sm:$0xff] %v3011_v9 }
 0x24f   : > { %v907_v13 = vmul.f32 1.442695, %v890_v10 }
 0x250   : > { %v905_v12 = vmul.f32 1.442695, %v889_v11 }
 0x252   : > { %2242 = vpow2.f32 %v905_v12  ;;  %v1948_v14 = vpop.f32.mrb[18].mxu1 }
 0x253   : > { %v3020_v15 = vadd.f32 %v1948_v14, %v2998_v5  ;;  %v820_v16 = vpop.f32.mrb[19].mxu1  ;;  %2244 = vpow2.f32 %v907_v13 }
 0x254   : > { %v3023_v17 = vadd.f32 %v2998_v5, %v820_v16 }
 0x255   : > { %1562 = vst [vmem:[%s3005_s14 + $0x18] sm:$0xff] %v3020_v15  ;;  %v892_v18 = vmul.f32 0.5, %v3020_v15 }
 0x256   : > { %v891_v19 = vmul.f32 0.5, %v3023_v17  ;;  %1561 = vst [vmem:[%s3005_s14 + $0x10] sm:$0xff] %v3023_v17 }
 0x257   : > { %v911_v21 = vmul.f32 1.442695, %v892_v18 }
 0x258   : > { %v909_v20 = vmul.f32 1.442695, %v891_v19 }
 0x25a   : > { %2246 = vpow2.f32 %v909_v20  ;;  %v1951_v22 = vpop.f32.mrb[20].mxu1 }
 0x25b   : > { %v3032_v23 = vadd.f32 %v1951_v22, %v2998_v5  ;;  %v830_v24 = vpop.f32.mrb[21].mxu1  ;;  %2248 = vpow2.f32 %v911_v21  ;;  %v1259_v22 = vld [vmem:[#allocation7 + $0x8] sm:$0xff] }
 0x25c   : > { %v2243_v25 = vpop.eup %2242  ;;  %v3035_v26 = vadd.f32 %v2998_v5, %v830_v24  ;;  %v1261_v24 = vld [vmem:[#allocation7 + $0x18] sm:$0xff] }
 0x25d   : > { %v894_v27 = vmul.f32 0.5, %v3032_v23  ;;  %1564 = vst [vmem:[%s3005_s14 + $0x28] sm:$0xff] %v3032_v23  ;;  %953 = vrot.lane.b32.xlu0 %v2243_v25, %s2535_s30  ;;  %v2245_v30 = vpop.eup %2244  ;;  %v1258_v25 = vld [vmem:[#allocation7] sm:$0xff] }
 0x25e   : > { %v893_v28 = vmul.f32 0.5, %v3035_v26  ;;  %1563 = vst [vmem:[%s3005_s14 + $0x20] sm:$0xff] %v3035_v26 }
 0x25f   : > { %v915_v29 = vmul.f32 1.442695, %v894_v27  ;;  %v2087_v27 = vpack.c.bf16 %v1261_v24, %v1259_v22  ;;  %v509_v24 = vld [vmem:[%s3124_s15 + $0x20] sm:$0xff] }
 0x260   : > { %v913_v31 = vmul.f32 1.442695, %v893_v28  ;;  %v1260_v28 = vld [vmem:[#allocation7 + $0x10] sm:$0xff] }
 0x261   : > { %2250 = vpow2.f32 %v915_v29  ;;  %955 = vrot.lane.b32.xlu0 %v2245_v30, %s2535_s30  ;;  %v1263_v29 = vld [vmem:[#allocation7 + $0x28] sm:$0xff]  ;;  %v1265_v30 = vld [vmem:[#allocation7 + $0x38] sm:$0xff]  ;;  %2088 = vmatprep.subr.bf16.mxu0 %v2087_v27 }
 0x262   : > { %2252 = vpow2.f32 %v913_v31  ;;  %v1954_v32 = vpop.f32.mrb[22].mxu1 }
 0x263   : > { %v3046_v33 = vadd.f32 %v1954_v32, %v2998_v5  ;;  %v840_v34 = vpop.f32.mrb[23].mxu1  ;;  %v2089_v32 = vpack.c.bf16 %v1260_v28, %v1258_v25 }
 0x264   : > { %v2247_v35 = vpop.eup %2246  ;;  %v3049_v36 = vadd.f32 %v2998_v5, %v840_v34  ;;  %v2091_v34 = vpack.c.bf16 %v1265_v30, %v1263_v29 }
 0x265   : > { %v896_v37 = vmul.f32 0.5, %v3046_v33  ;;  %1566 = vst [vmem:[%s3005_s14 + $0x38] sm:$0xff] %v3046_v33  ;;  %957 = vrot.lane.b32.xlu1 %v2247_v35, %s2535_s30  ;;  %v2249_v44 = vpop.eup %2248  ;;  %v1262_v35 = vld [vmem:[#allocation7 + $0x20] sm:$0xff]  ;;  %2090 = vmatpush1.bf16.msra.mxu0 %v2089_v32  ;;  %v511_v32 = vld [vmem:[%s3124_s15 + $0x30] sm:$0xff] }
 0x266   : > { %v895_v38 = vmul.f32 0.5, %v3049_v36  ;;  %1565 = vst [vmem:[%s3005_s14 + $0x30] sm:$0xff] %v3049_v36  ;;  %v1957_v39 = vpop.f32.mrb[24].mxu1  ;;  %2092 = vmatprep.subr.bf16.mxu0 %v2091_v34 }
 0x267   : > { %v919_v40 = vmul.f32 1.442695, %v896_v37  ;;  %v3059_v41 = vadd.f32 %v1957_v39, %v2998_v5  ;;  %v850_v43 = vpop.f32.mrb[25].mxu1  ;;  %v1264_v37 = vld [vmem:[#allocation7 + $0x30] sm:$0xff] }
 0x268   : > { %v917_v45 = vmul.f32 1.442695, %v895_v38  ;;  %v3062_v46 = vadd.f32 %v2998_v5, %v850_v43  ;;  %v1267_v38 = vld [vmem:[#allocation7 + $0x48] sm:$0xff]  ;;  %v2093_v43 = vpack.c.bf16 %v1264_v37, %v1262_v35 }
 0x269   : > { %2254 = vpow2.f32 %v919_v40  ;;  %v898_v47 = vmul.f32 0.5, %v3059_v41  ;;  %1568 = vst [vmem:[%s3005_s14 + $0x48] sm:$0xff] %v3059_v41  ;;  %959 = vrot.lane.b32.xlu1 %v2249_v44, %s2535_s30  ;;  %v1269_v40 = vld [vmem:[#allocation7 + $0x58] sm:$0xff] }
 0x26a   : > { %2256 = vpow2.f32 %v917_v45  ;;  %v897_v48 = vmul.f32 0.5, %v3062_v46  ;;  %1567 = vst [vmem:[%s3005_s14 + $0x40] sm:$0xff] %v3062_v46  ;;  %v1960_v49 = vpop.f32.mrb[26].mxu1  ;;  %v2095_v44 = vpack.c.bf16 %v1269_v40, %v1267_v38  ;;  %v1266_v45 = vld [vmem:[#allocation7 + $0x40] sm:$0xff]  ;;  %2094 = vmatpush1.bf16.msra.mxu0 %v2093_v43  ;;  %v514_v38 = vld [vmem:[%s3124_s15 + $0x48] sm:$0xff] }
 0x26b   : > { %v2251_v50 = vpop.eup %2250  ;;  %v923_v51 = vmul.f32 1.442695, %v898_v47  ;;  %v3072_v52 = vadd.f32 %v1960_v49, %v2998_v5  ;;  %v860_v53 = vpop.f32.mrb[27].mxu1  ;;  %v1268_v47 = vld [vmem:[#allocation7 + $0x50] sm:$0xff]  ;;  %v1271_v49 = vld [vmem:[#allocation7 + $0x68] sm:$0xff] }
 0x26c   : > { %v2253_v54 = vpop.eup %2252  ;;  %v921_v55 = vmul.f32 1.442695, %v897_v48  ;;  %v3075_v56 = vadd.f32 %v2998_v5, %v860_v53  ;;  %v2097_v53 = vpack.c.bf16 %v1268_v47, %v1266_v45  ;;  %2096 = vmatprep.subr.bf16.mxu0 %v2095_v44  ;;  %v516_v47 = vld [vmem:[%s3124_s15 + $0x58] sm:$0xff] }
 0x26d   : > { %2258 = vpow2.f32 %v923_v51  ;;  %v900_v57 = vmul.f32 0.5, %v3072_v52  ;;  %1570 = vst [vmem:[%s3005_s14 + $0x58] sm:$0xff] %v3072_v52  ;;  %963 = vrot.lane.b32.xlu1 %v2251_v50, %s2535_s30  ;;  %961 = vrot.lane.b32.xlu0 %v2253_v54, %s2535_s30  ;;  %v1273_v50 = vld [vmem:[#allocation7 + $0x78] sm:$0xff] }
 0x26e   : > { %2260 = vpow2.f32 %v921_v55  ;;  %v899_v58 = vmul.f32 0.5, %v3075_v56  ;;  %1569 = vst [vmem:[%s3005_s14 + $0x50] sm:$0xff] %v3075_v56  ;;  %v1963_v42 = vpop.f32.mrb[28].mxu1  ;;  %v2099_v54 = vpack.c.bf16 %v1273_v50, %v1271_v49  ;;  %v1270_v55 = vld [vmem:[#allocation7 + $0x60] sm:$0xff]  ;;  %2098 = vmatpush1.bf16.msra.mxu0 %v2097_v53 }
 0x26f   : > { %v927_v59 = vmul.f32 1.442695, %v900_v57  ;;  %v3086_v60 = vadd.f32 %v1963_v42, %v2998_v5  ;;  %v870_v61 = vpop.f32.mrb[29].mxu1  ;;  %v1272_v57 = vld [vmem:[#allocation7 + $0x70] sm:$0xff]  ;;  %v1277_v42 = vld [vmem:[#allocation7 + $0x98] sm:$0xff] }
 0x270   : > { %v925_v62 = vmul.f32 1.442695, %v899_v58  ;;  %v3089_v63 = vadd.f32 %v2998_v5, %v870_v61  ;;  %v1275_v58 = vld [vmem:[#allocation7 + $0x88] sm:$0xff]  ;;  %2100 = vmatprep.subr.bf16.mxu0 %v2099_v54 }
 0x271   : > { %2262 = vpow2.f32 %v927_v59  ;;  %v902_v0 = vmul.f32 0.5, %v3086_v60  ;;  %1572 = vst [vmem:[%s3005_s14 + $0x68] sm:$0xff] %v3086_v60  ;;  %v2101_v59 = vpack.c.bf16 %v1272_v57, %v1270_v55  ;;  %v2103_v61 = vpack.c.bf16 %v1277_v42, %v1275_v58  ;;  %v518_v54 = vld [vmem:[%s3124_s15 + $0x68] sm:$0xff]  ;;  %v517_v55 = vld [vmem:[%s3124_s15 + $0x60] sm:$0xff] }
 0x272   : > { %2264 = vpow2.f32 %v925_v62  ;;  %v901_v1 = vmul.f32 0.5, %v3089_v63  ;;  %1571 = vst [vmem:[%s3005_s14 + $0x60] sm:$0xff] %v3089_v63  ;;  %v1966_v2 = vpop.f32.mrb[30].mxu1  ;;  %v1274_v62 = vld [vmem:[#allocation7 + $0x80] sm:$0xff] }
 0x273   : > { %v2255_v3 = vpop.eup %2254  ;;  %v931_v4 = vmul.f32 1.442695, %v902_v0  ;;  %v3098_v6 = vadd.f32 %v1966_v2, %v2998_v5  ;;  %v880_v8 = vpop.f32.mrb[31].mxu1  ;;  %v1276_v0 = vld [vmem:[#allocation7 + $0x90] sm:$0xff]  ;;  %2102 = vmatpush1.bf16.msra.mxu0 %v2101_v59  ;;  %v505_v2 = vld [vmem:[%s3124_s15] sm:$0xff] }
 0x274   : > { %v2257_v10 = vpop.eup %2256  ;;  %v929_v11 = vmul.f32 1.442695, %v901_v1  ;;  %v3101_v12 = vadd.f32 %v2998_v5, %v880_v8  ;;  %967 = vrot.lane.b32.xlu1 %v2255_v3, %s2535_s30  ;;  %v2105_v1 = vpack.c.bf16 %v1276_v0, %v1274_v62  ;;  %2104 = vmatprep.subr.bf16.mxu0 %v2103_v61  ;;  %v506_v8 = vld [vmem:[%s3124_s15 + $0x8] sm:$0xff]  ;;  %v519_v62 = vld [vmem:[%s3124_s15 + $0x70] sm:$0xff] }
 0x275   : > { %2266 = vpow2.f32 %v931_v4  ;;  %v904_v13 = vmul.f32 0.5, %v3098_v6  ;;  %1574 = vst [vmem:[%s3005_s14 + $0x78] sm:$0xff] %v3098_v6  ;;  %965 = vrot.lane.b32.xlu0 %v2257_v10, %s2535_s30 }
 0x276   : > { %2268 = vpow2.f32 %v929_v11  ;;  %v903_v14 = vmul.f32 0.5, %v3101_v12  ;;  %1573 = vst [vmem:[%s3005_s14 + $0x70] sm:$0xff] %v3101_v12  ;;  %s1595_s14 = sshll.u32 %s3228_s10, 4  ;;  %s3291_s14 = int_to_ptr.vmem [resolvable:$true] %s1595_s14 }
 0x277   : > { %v2259_v16 = vpop.eup %2258  ;;  %v935_v18 = vmul.f32 1.442695, %v904_v13  ;;  %2106 = vmatpush1.bf16.msra.mxu0 %v2105_v1  ;;  %s2456_s21 = scalar_lea.vmem %s3291_s14, 4096  ;;  %p2463_p9 = scmp.lt.s32.totalorder %s3291_s14, %s2461_s22 }
 0x278   : > { %v2261_v19 = vpop.eup %2260  ;;  %v933_v20 = vmul.f32 1.442695, %v903_v14  ;;  %971 = vrot.lane.b32.xlu1 %v2259_v16, %s2535_s30  ;;  %v507_v14 = vld [vmem:[%s3124_s15 + $0x10] sm:$0xff]  ;;  %p2457_p0 = scmp.ne.s32.totalorder %s3291_s14, %s2456_s21  ;;  %p2464_p12 = scmp.lt.s32.totalorder %s2462_s26, %s2456_s21 }
 0x279   : > { %2270 = vpow2.f32 %v935_v18  ;;  %969 = vrot.lane.b32.xlu0 %v2261_v19, %s2535_s30 }
 0x27a   : > { %2272 = vpow2.f32 %v933_v20  ;;  %v508_v20 = vld [vmem:[%s3124_s15 + $0x18] sm:$0xff]  ;;  %p2458_p3 = pnand %p2457_p0, %p3375_p1  ;;  %p2465_p2 = por %p2464_p12, %p2463_p9 }
 0x27b   : > { %v2263_v5 = vpop.eup %2262 }
 0x27c   : > { %v2265_v21 = vpop.eup %2264  ;;  %975 = vrot.lane.b32.xlu1 %v2263_v5, %s2535_s30  ;;  %p2459_p5 = pneg %p2458_p3 }
 0x27d   : > { %973 = vrot.lane.b32.xlu0 %v2265_v21, %s2535_s30 }
 0x27e   : > { %p2466_p13 = pnand %p2465_p2, %p2459_p5 }
 0x27f   : > { %v2267_v31 = vpop.eup %2266 }
 0x280   : > { %v2269_v39 = vpop.eup %2268  ;;  %979 = vrot.lane.b32.xlu1 %v2267_v31, %s2535_s30  ;;  %v512_v31 = vld [vmem:[%s3124_s15 + $0x38] sm:$0xff] }
 0x281   : > { %977 = vrot.lane.b32.xlu0 %v2269_v39, %s2535_s30  ;;  %v513_v39 = vld [vmem:[%s3124_s15 + $0x40] sm:$0xff] }
 0x283   : > { %v2271_v48 = vpop.eup %2270 }
 0x284   : > { %v2273_v51 = vpop.eup %2272  ;;  %983 = vrot.lane.b32.xlu1 %v2271_v48, %s2535_s30  ;;  %v515_v48 = vld [vmem:[%s3124_s15 + $0x50] sm:$0xff] }
 0x285   : > { %981 = vrot.lane.b32.xlu0 %v2273_v51, %s2535_s30 }
 0x2cf   : > { %v954_v3 = vpop.permute.xlu0 %953 }
 0x2d0   : > { %v1001_v4 = vmul.f32 %v954_v3, %v505_v2 }
 0x2d2   : > { %v1017_v10 = vadd.f32 %v1001_v4, %v3011_v9  ;;  %v510_v9 = vld [vmem:[%s3124_s15 + $0x28] sm:$0xff] }
 0x2d3   : > { %v956_v11 = vpop.permute.xlu0 %955 }
 0x2d4   : > { %v1002_v13 = vmul.f32 %v956_v11, %v506_v8  ;;  %1983 = vmatprep.mubr.msk.f32.mxu1 %vm1048_vm0, %v1017_v10  ;;  %v1279_v10 = vld [vmem:[#allocation7 + $0xa8] sm:$0xff] }
 0x2d6   : > { %v1018_v16 = vadd.f32 %v1002_v13, %v3008_v7  ;;  %v1278_v13 = vld [vmem:[#allocation7 + $0xa0] sm:$0xff] }
 0x2d7   : > { %v958_v18 = vpop.permute.xlu1 %957 }
 0x2d8   : > { %v1003_v19 = vmul.f32 %v958_v18, %v507_v14  ;;  %1984 = vmatmul.mubr.msk.f32.vlgmr.msra.gmra.mrb[32].mxu1 %vm1048_vm0, %v1018_v16  ;;  %v1283_v16 = vld [vmem:[#allocation7 + $0xc8] sm:$0xff]  ;;  %v1285_v18 = vld [vmem:[#allocation7 + $0xd8] sm:$0xff] }
 0x2da   : > { %v1019_v5 = vadd.f32 %v1003_v19, %v3023_v17  ;;  %v1282_v19 = vld [vmem:[#allocation7 + $0xc0] sm:$0xff] }
 0x2db   : > { %v960_v21 = vpop.permute.xlu1 %959 }
 0x2dc   : > { %v1004_v22 = vmul.f32 %v960_v21, %v508_v20  ;;  %1986 = vmatprep.mubr.msk.f32.mxu1 %vm1048_vm0, %v1019_v5  ;;  %v2111_v20 = vpack.c.bf16 %v1285_v18, %v1283_v16  ;;  %v1284_v5 = vld [vmem:[#allocation7 + $0xd0] sm:$0xff]  ;;  %v1289_v21 = vld [vmem:[#allocation7 + $0xf8] sm:$0xff]  ;;  %v1290_v18 = vld [vmem:[%s3346_s9] sm:$0x3] }
 0x2de   : > { %v1020_v25 = vadd.f32 %v1004_v22, %v3020_v15 }
 0x2df   : > { %v964_v27 = vpop.permute.xlu1 %963  ;;  %v962_v7 = vpop.permute.xlu0 %961 }
 0x2e0   : > { %v1006_v28 = vmul.f32 %v964_v27, %v510_v9  ;;  %v1005_v29 = vmul.f32 %v962_v7, %v509_v24  ;;  %1987 = vmatmul.mubr.msk.f32.gmra.mrb[34].mxu1 %vm1048_vm0, %v1020_v25  ;;  %v1286_v9 = vld [vmem:[#allocation7 + $0xe0] sm:$0xff]  ;;  %v1288_v24 = vld [vmem:[#allocation7 + $0xf0] sm:$0xff]  ;;  %v2536_v27 = vmov 0.0  }
 0x2e1   : > { %v2117_v25 = vpack.c.bf16 %v1288_v24, %v1286_v9  ;;  %1366 = vmatprep.mubr.f32.mxu0 %v2536_v27  ;;  %v3178_v7 = vld [vmem:[%s3344_s7] ss:$0 sm:$0xff] }
 0x2e2   : > { %v1022_v30 = vadd.f32 %v1006_v28, %v3032_v23  ;;  %v1021_v17 = vadd.f32 %v1005_v29, %v3035_v26 }
 0x2e4   : > { %1989 = vmatprep.mubr.msk.f32.mxu1 %vm1048_vm0, %v1021_v17 }
 0x2e5   : > { %1990 = vmatmul.mubr.msk.f32.gmra.mrb[36].mxu1 %vm1048_vm0, %v1022_v30 }
 0x2e6   : > { %v968_v15 = vpop.permute.xlu1 %967 }
 0x2e7   : > { %v1008_v34 = vmul.f32 %v968_v15, %v512_v31  ;;  %v966_v35 = vpop.permute.xlu0 %965 }
 0x2e8   : > { %v1007_v37 = vmul.f32 %v966_v35, %v511_v32 }
 0x2e9   : > { %v1024_v23 = vadd.f32 %v1008_v34, %v3046_v33 }
 0x2ea   : > { %v1023_v40 = vadd.f32 %v1007_v37, %v3049_v36  ;;  %v972_v43 = vpop.permute.xlu1 %971 }
 0x2eb   : > { %v1010_v26 = vmul.f32 %v972_v43, %v514_v38  ;;  %v970_v44 = vpop.permute.xlu0 %969 }
 0x2ec   : > { %v1009_v45 = vmul.f32 %v970_v44, %v513_v39  ;;  %1992 = vmatprep.mubr.msk.f32.mxu1 %vm1048_vm0, %v1023_v40 }
 0x2ed   : > { %1993 = vmatmul.mubr.msk.f32.gmra.mrb[38].mxu1 %vm1048_vm0, %v1024_v23  ;;  %v1026_v36 = vadd.f32 %v1010_v26, %v3059_v41  ;;  %v520_v41 = vld [vmem:[%s3124_s15 + $0x78] sm:$0xff]  ;;  %s3289_s15 = scalar_lea.hbm %s3374_s23, %s1774_s24 }
 0x2ee   : > { %v1025_v49 = vadd.f32 %v1009_v45, %v3062_v46  ;;  %v976_v50 = vpop.permute.xlu1 %975 }
 0x2ef   : > { %v1012_v51 = vmul.f32 %v976_v50, %v516_v47  ;;  %v974_v53 = vpop.permute.xlu0 %973 }
 0x2f0   : > { %v1011_v33 = vmul.f32 %v974_v53, %v515_v48  ;;  %1995 = vmatprep.mubr.msk.f32.mxu1 %vm1048_vm0, %v1025_v49 }
 0x2f1   : > { %1996 = vmatmul.mubr.msk.f32.gmra.mrb[40].mxu1 %vm1048_vm0, %v1026_v36  ;;  %v1028_v42 = vadd.f32 %v1012_v51, %v3072_v52 }
 0x2f2   : > { %v1027_v57 = vadd.f32 %v1011_v33, %v3075_v56  ;;  %v980_v58 = vpop.permute.xlu1 %979 }
 0x2f3   : > { %v1014_v46 = vmul.f32 %v980_v58, %v518_v54  ;;  %v978_v59 = vpop.permute.xlu0 %977 }
 0x2f4   : > { %v1013_v61 = vmul.f32 %v978_v59, %v517_v55  ;;  %1998 = vmatprep.mubr.msk.f32.mxu1 %vm1048_vm0, %v1027_v57 }
 0x2f5   : > { %1999 = vmatmul.mubr.msk.f32.gmra.mrb[42].mxu1 %vm1048_vm0, %v1028_v42  ;;  %v1030_v2 = vadd.f32 %v1014_v46, %v3086_v60  ;;  %v1280_v60 = vld [vmem:[#allocation7 + $0xb0] sm:$0xff] }
 0x2f6   : > { %v1029_v0 = vadd.f32 %v1013_v61, %v3089_v63  ;;  %v984_v1 = vpop.permute.xlu1 %983  ;;  %v1281_v63 = vld [vmem:[#allocation7 + $0xb8] sm:$0xff]  ;;  %v2109_v14 = vpack.c.bf16 %v1280_v60, %v1278_v13  ;;  %v1292_v60 = vlaneseq }
 0x2f7   : > { %v1016_v3 = vmul.f32 %v984_v1, %v520_v41  ;;  %v982_v4 = vpop.permute.xlu0 %981  ;;  %v2107_v11 = vpack.c.bf16 %v1281_v63, %v1279_v10 }
 0x2f8   : > { %v1015_v56 = vmul.f32 %v982_v4, %v519_v62  ;;  %2001 = vmatprep.mubr.msk.f32.mxu1 %vm1048_vm0, %v1029_v0 }
 0x2f9   : > { %2002 = vmatmul.mubr.msk.f32.gmra.mrb[44].mxu1 %vm1048_vm0, %v1030_v2  ;;  %v1032_v8 = vadd.f32 %v1016_v3, %v3098_v6  ;;  %2108 = vmatprep.subr.bf16.mxu0 %v2107_v11  ;;  %v1287_v6 = vld [vmem:[#allocation7 + $0xe8] sm:$0xff] }
 0x2fa   : > { %v1031_v52 = vadd.f32 %v1015_v56, %v3101_v12  ;;  %2110 = vmatpush1.bf16.msra.mxu0 %v2109_v14  ;;  %v2113_v12 = vpack.c.bf16 %v1284_v5, %v1282_v19  ;;  %v2115_v22 = vpack.c.bf16 %v1289_v21, %v1287_v6  ;;  %v1293_v14 = vshrl.u32 %v1292_v60, 7 }
 0x2fb   : > { %2112 = vmatprep.subr.bf16.mxu0 %v2111_v20 }
 0x2fc   : > { %2004 = vmatprep.mubr.msk.f32.mxu1 %vm1048_vm0, %v1031_v52  ;;  %v1294_v16 = vsub.s32 0, %v1293_v14  ;;  %v1298_v19 = vsub.s32 1, %v1293_v14 }
 0x2fd   : > { %2005 = vmatmul.mubr.msk.f32.gmra.mrb[46].mxu1 %vm1048_vm0, %v1032_v8 }
 0x2fe   : > { %2114 = vmatpush1.bf16.msra.mxu0 %v2113_v12  ;;  %v3214_v20 = vrot.slane %v1290_v18, %v1294_v16  ;;  %v3216_v5 = vrot.slane %v1290_v18, %v1298_v19 }
 0x2ff   : > { %2116 = vmatprep.subr.bf16.mxu0 %v2115_v22 }
 0x302   : > { %2118 = vmatpush1.bf16.msra.mxu0 %v2117_v25 }
 0x3ab   : > { %v1985_v28 = vpop.f32.mrb[32].mxu1 }
 0x3ac   : > { %v1163_v29 = vpop.f32.mrb[33].mxu1  ;;  %v1169_v17 = vadd.f32 %v1985_v28, %v3178_v7 }
 0x3ad   : > { %v1164_v30 = vadd.f32 %v3178_v7, %v1163_v29 }
 0x3af   : > { %2274 = vtanh.f32 %v1164_v30 }
 0x3b0   : > { %2276 = vtanh.f32 %v1169_v17 }
 0x3b3   : > { %v1988_v31 = vpop.f32.mrb[34].mxu1 }
 0x3b4   : > { %v1173_v32 = vpop.f32.mrb[35].mxu1  ;;  %v1179_v34 = vadd.f32 %v1988_v31, %v3178_v7 }
 0x3b5   : > { %v1174_v15 = vadd.f32 %v3178_v7, %v1173_v32 }
 0x3b7   : > { %2278 = vtanh.f32 %v1174_v15 }
 0x3b8   : > { %v1991_v35 = vpop.f32.mrb[36].mxu1  ;;  %2280 = vtanh.f32 %v1179_v34 }
 0x3b9   : > { %v2275_v37 = vpop.eup %2274  ;;  %v1183_v38 = vpop.f32.mrb[37].mxu1  ;;  %v1189_v43 = vadd.f32 %v1991_v35, %v3178_v7 }
 0x3ba   : > { %1367 = vmatmul.mubr.f32.vlgmr.msra.gmra.mrb[16].mxu0 %v2275_v37  ;;  %v1184_v39 = vadd.f32 %v3178_v7, %v1183_v38  ;;  %v2277_v40 = vpop.eup %2276 }
 0x3bb   : > { %1372 = vmatprep.mubr.f32.mxu0 %v2536_v27 }
 0x3bc   : > { %2282 = vtanh.f32 %v1184_v39 }
 0x3bd   : > { %2284 = vtanh.f32 %v1189_v43 }
 0x3be   : > { %1373 = vmatmul.mubr.f32.gmra.mrb[18].mxu0 %v2277_v40 }
 0x3bf   : > { %1378 = vmatprep.mubr.f32.mxu0 %v2536_v27 }
 0x3c0   : > { %v1994_v23 = vpop.f32.mrb[38].mxu1 }
 0x3c1   : > { %v2279_v26 = vpop.eup %2278  ;;  %v1193_v44 = vpop.f32.mrb[39].mxu1  ;;  %v1199_v50 = vadd.f32 %v1994_v23, %v3178_v7 }
 0x3c2   : > { %1379 = vmatmul.mubr.f32.gmra.mrb[20].mxu0 %v2279_v26  ;;  %v1194_v45 = vadd.f32 %v3178_v7, %v1193_v44  ;;  %v2281_v48 = vpop.eup %2280 }
 0x3c3   : > { %1384 = vmatprep.mubr.f32.mxu0 %v2536_v27 }
 0x3c4   : > { %v1997_v47 = vpop.f32.mrb[40].mxu1  ;;  %2286 = vtanh.f32 %v1194_v45 }
 0x3c5   : > { %v1203_v49 = vpop.f32.mrb[41].mxu1  ;;  %2288 = vtanh.f32 %v1199_v50  ;;  %v1209_v58 = vadd.f32 %v1997_v47, %v3178_v7 }
 0x3c6   : > { %1385 = vmatmul.mubr.f32.gmra.mrb[22].mxu0 %v2281_v48  ;;  %v2283_v51 = vpop.eup %2282  ;;  %v1204_v33 = vadd.f32 %v3178_v7, %v1203_v49 }
 0x3c7   : > { %1390 = vmatprep.mubr.f32.mxu0 %v2536_v27  ;;  %v2285_v55 = vpop.eup %2284 }
 0x3c8   : > { %v2000_v36 = vpop.f32.mrb[42].mxu1  ;;  %2290 = vtanh.f32 %v1204_v33 }
 0x3c9   : > { %v1213_v53 = vpop.f32.mrb[43].mxu1  ;;  %2292 = vtanh.f32 %v1209_v58  ;;  %v1219_v62 = vadd.f32 %v2000_v36, %v3178_v7 }
 0x3ca   : > { %1391 = vmatmul.mubr.f32.gmra.mrb[24].mxu0 %v2283_v51  ;;  %v1214_v61 = vadd.f32 %v3178_v7, %v1213_v53 }
 0x3cb   : > { %1396 = vmatprep.mubr.f32.mxu0 %v2536_v27 }
 0x3cc   : > { %v2003_v54 = vpop.f32.mrb[44].mxu1  ;;  %2294 = vtanh.f32 %v1214_v61 }
 0x3cd   : > { %v1223_v57 = vpop.f32.mrb[45].mxu1  ;;  %2296 = vtanh.f32 %v1219_v62  ;;  %v1229_v3 = vadd.f32 %v2003_v54, %v3178_v7 }
 0x3ce   : > { %1397 = vmatmul.mubr.f32.gmra.mrb[26].mxu0 %v2285_v55  ;;  %v2287_v46 = vpop.eup %2286  ;;  %v1224_v1 = vadd.f32 %v3178_v7, %v1223_v57 }
 0x3cf   : > { %1402 = vmatprep.mubr.f32.mxu0 %v2536_v27  ;;  %v2289_v41 = vpop.eup %2288 }
 0x3d0   : > { %v2006_v42 = vpop.f32.mrb[46].mxu1  ;;  %2298 = vtanh.f32 %v1224_v1 }
 0x3d1   : > { %v1233_v59 = vpop.f32.mrb[47].mxu1  ;;  %2300 = vtanh.f32 %v1229_v3  ;;  %v1239_v8 = vadd.f32 %v2006_v42, %v3178_v7 }
 0x3d2   : > { %1403 = vmatmul.mubr.f32.gmra.mrb[28].mxu0 %v2287_v46  ;;  %v2291_v0 = vpop.eup %2290  ;;  %v1234_v56 = vadd.f32 %v3178_v7, %v1233_v59 }
 0x3d3   : > { %1408 = vmatprep.mubr.f32.mxu0 %v2536_v27  ;;  %v2293_v2 = vpop.eup %2292 }
 0x3d4   : > { %2302 = vtanh.f32 %v1234_v56 }
 0x3d5   : > { %2304 = vtanh.f32 %v1239_v8 }
 0x3d6   : > { %1409 = vmatmul.mubr.f32.gmra.mrb[30].mxu0 %v2289_v41  ;;  %v2295_v4 = vpop.eup %2294 }
 0x3d7   : > { %1414 = vmatprep.mubr.f32.mxu0 %v2536_v27  ;;  %v2297_v52 = vpop.eup %2296 }
 0x3da   : > { %1415 = vmatmul.mubr.f32.gmra.mrb[32].mxu0 %v2291_v0  ;;  %v2299_v10 = vpop.eup %2298 }
 0x3db   : > { %1420 = vmatprep.mubr.f32.mxu0 %v2536_v27  ;;  %v2301_v63 = vpop.eup %2300 }
 0x3de   : > { %1421 = vmatmul.mubr.f32.gmra.mrb[34].mxu0 %v2293_v2  ;;  %v2303_v11 = vpop.eup %2302 }
 0x3df   : > { %1426 = vmatprep.mubr.f32.mxu0 %v2536_v27  ;;  %v2305_v13 = vpop.eup %2304 }
 0x3e2   : > { %1427 = vmatmul.mubr.f32.gmra.mrb[36].mxu0 %v2295_v4 }
 0x3e3   : > { %1432 = vmatprep.mubr.f32.mxu0 %v2536_v27 }
 0x3e6   : > { %1433 = vmatmul.mubr.f32.gmra.mrb[38].mxu0 %v2297_v52 }
 0x3e7   : > { %1438 = vmatprep.mubr.f32.mxu0 %v2536_v27 }
 0x3ea   : > { %1439 = vmatmul.mubr.f32.gmra.mrb[40].mxu0 %v2299_v10 }
 0x3eb   : > { %1444 = vmatprep.mubr.f32.mxu0 %v2536_v27 }
 0x3ee   : > { %1445 = vmatmul.mubr.f32.gmra.mrb[42].mxu0 %v2301_v63 }
 0x3ef   : > { %1450 = vmatprep.mubr.f32.mxu0 %v2536_v27 }
 0x3f2   : > { %1451 = vmatmul.mubr.f32.gmra.mrb[44].mxu0 %v2303_v11 }
 0x3f3   : > { %1456 = vmatprep.mubr.f32.mxu0 %v2536_v27 }
 0x3f6   : > { %1457 = vmatmul.mubr.f32.gmra.mrb[46].mxu0 %v2305_v13 }
 0x48d   : > { %v1368_v12 = vpop.f32.mrb[16].mxu0 }
 0x48e   : > { %v1369_v6 = vadd.f32 %v1368_v12, %v3214_v20  ;;  %v1370_v21 = vpop.f32.mrb[17].mxu0 }
 0x48f   : > { %v1371_v22 = vadd.f32 %v1370_v21, %v3216_v5 }
 0x490   : > { %v1463_v9 = vmul.f32 1.442695, %v1369_v6 }
 0x491   : > { %v1465_v24 = vmul.f32 1.442695, %v1371_v22  ;;  %v1374_v25 = vpop.f32.mrb[18].mxu0 }
 0x492   : > { %2306 = vpow2.f32 %v1463_v9  ;;  %v1375_v27 = vadd.f32 %v1374_v25, %v3214_v20  ;;  %v1376_v7 = vpop.f32.mrb[19].mxu0 }
 0x493   : > { %2308 = vpow2.f32 %v1465_v24  ;;  %v1377_v28 = vadd.f32 %v1376_v7, %v3216_v5 }
 0x494   : > { %v1467_v29 = vmul.f32 1.442695, %v1375_v27 }
 0x495   : > { %v1469_v30 = vmul.f32 1.442695, %v1377_v28  ;;  %v1380_v17 = vpop.f32.mrb[20].mxu0 }
 0x496   : > { %2310 = vpow2.f32 %v1467_v29  ;;  %v1381_v31 = vadd.f32 %v1380_v17, %v3214_v20  ;;  %v1382_v32 = vpop.f32.mrb[21].mxu0 }
 0x497   : > { %2312 = vpow2.f32 %v1469_v30  ;;  %v1383_v15 = vadd.f32 %v1382_v32, %v3216_v5 }
 0x498   : > { %v1471_v34 = vmul.f32 1.442695, %v1381_v31 }
 0x499   : > { %v1473_v35 = vmul.f32 1.442695, %v1383_v15  ;;  %v1386_v37 = vpop.f32.mrb[22].mxu0 }
 0x49a   : > { %2314 = vpow2.f32 %v1471_v34  ;;  %v1387_v38 = vadd.f32 %v1386_v37, %v3214_v20  ;;  %v1388_v39 = vpop.f32.mrb[23].mxu0 }
 0x49b   : > { %2316 = vpow2.f32 %v1473_v35  ;;  %v1389_v40 = vadd.f32 %v1388_v39, %v3216_v5 }
 0x49c   : > { %v2307_v43 = vpop.eup %2306  ;;  %v1475_v23 = vmul.f32 1.442695, %v1387_v38 }
 0x49d   : > { %v2309_v26 = vpop.eup %2308  ;;  %1527 = vst [vmem:[%s3228_s10] sm:$0xff] %v2307_v43  ;;  %v1477_v44 = vmul.f32 1.442695, %v1389_v40  ;;  %v1392_v45 = vpop.f32.mrb[24].mxu0 }
 0x49e   : > { %1528 = vst [vmem:[%s3228_s10 + $0x8] sm:$0xff] %v2309_v26  ;;  %2318 = vpow2.f32 %v1475_v23  ;;  %v1393_v47 = vadd.f32 %v1392_v45, %v3214_v20  ;;  %v1394_v48 = vpop.f32.mrb[25].mxu0 }
 0x49f   : > { %2320 = vpow2.f32 %v1477_v44  ;;  %v1395_v49 = vadd.f32 %v1394_v48, %v3216_v5 }
 0x4a0   : > { %v2311_v50 = vpop.eup %2310  ;;  %v1479_v36 = vmul.f32 1.442695, %v1393_v47 }
 0x4a1   : > { %v2313_v51 = vpop.eup %2312  ;;  %1529 = vst [vmem:[%s3228_s10 + $0x10] sm:$0xff] %v2311_v50  ;;  %v1481_v53 = vmul.f32 1.442695, %v1395_v49  ;;  %v1398_v33 = vpop.f32.mrb[26].mxu0 }
 0x4a2   : > { %1530 = vst [vmem:[%s3228_s10 + $0x18] sm:$0xff] %v2313_v51  ;;  %2322 = vpow2.f32 %v1479_v36  ;;  %v1399_v54 = vadd.f32 %v1398_v33, %v3214_v20  ;;  %v1400_v55 = vpop.f32.mrb[27].mxu0 }
 0x4a3   : > { %2324 = vpow2.f32 %v1481_v53  ;;  %v1401_v57 = vadd.f32 %v1400_v55, %v3216_v5 }
 0x4a4   : > { %v2315_v58 = vpop.eup %2314  ;;  %v1483_v42 = vmul.f32 1.442695, %v1399_v54 }
 0x4a5   : > { %v2317_v46 = vpop.eup %2316  ;;  %1531 = vst [vmem:[%s3228_s10 + $0x20] sm:$0xff] %v2315_v58  ;;  %v1485_v59 = vmul.f32 1.442695, %v1401_v57  ;;  %v1404_v61 = vpop.f32.mrb[28].mxu0 }
 0x4a6   : > { %1532 = vst [vmem:[%s3228_s10 + $0x28] sm:$0xff] %v2317_v46  ;;  %2326 = vpow2.f32 %v1483_v42  ;;  %v1405_v41 = vadd.f32 %v1404_v61, %v3214_v20  ;;  %v1406_v62 = vpop.f32.mrb[29].mxu0 }
 0x4a7   : > { %2328 = vpow2.f32 %v1485_v59  ;;  %v1407_v0 = vadd.f32 %v1406_v62, %v3216_v5 }
 0x4a8   : > { %v2319_v1 = vpop.eup %2318  ;;  %v1487_v2 = vmul.f32 1.442695, %v1405_v41 }
 0x4a9   : > { %v2321_v3 = vpop.eup %2320  ;;  %1533 = vst [vmem:[%s3228_s10 + $0x30] sm:$0xff] %v2319_v1  ;;  %v1489_v4 = vmul.f32 1.442695, %v1407_v0  ;;  %v1410_v56 = vpop.f32.mrb[30].mxu0 }
 0x4aa   : > { %1534 = vst [vmem:[%s3228_s10 + $0x38] sm:$0xff] %v2321_v3  ;;  %2330 = vpow2.f32 %v1487_v2  ;;  %v1411_v52 = vadd.f32 %v1410_v56, %v3214_v20  ;;  %v1412_v8 = vpop.f32.mrb[31].mxu0 }
 0x4ab   : > { %2332 = vpow2.f32 %v1489_v4  ;;  %v1413_v10 = vadd.f32 %v1412_v8, %v3216_v5 }
 0x4ac   : > { %v2323_v63 = vpop.eup %2322  ;;  %v1491_v11 = vmul.f32 1.442695, %v1411_v52 }
 0x4ad   : > { %v2325_v13 = vpop.eup %2324  ;;  %1535 = vst [vmem:[%s3228_s10 + $0x40] sm:$0xff] %v2323_v63  ;;  %v1493_v60 = vmul.f32 1.442695, %v1413_v10  ;;  %v1416_v14 = vpop.f32.mrb[32].mxu0 }
 0x4ae   : > { %1536 = vst [vmem:[%s3228_s10 + $0x48] sm:$0xff] %v2325_v13  ;;  %2334 = vpow2.f32 %v1491_v11  ;;  %v1417_v16 = vadd.f32 %v1416_v14, %v3214_v20  ;;  %v1418_v18 = vpop.f32.mrb[33].mxu0 }
 0x4af   : > { %2336 = vpow2.f32 %v1493_v60  ;;  %v1419_v19 = vadd.f32 %v1418_v18, %v3216_v5 }
 0x4b0   : > { %v2327_v12 = vpop.eup %2326  ;;  %v1495_v6 = vmul.f32 1.442695, %v1417_v16 }
 0x4b1   : > { %v2329_v21 = vpop.eup %2328  ;;  %1537 = vst [vmem:[%s3228_s10 + $0x50] sm:$0xff] %v2327_v12  ;;  %v1497_v22 = vmul.f32 1.442695, %v1419_v19  ;;  %v1422_v9 = vpop.f32.mrb[34].mxu0 }
 0x4b2   : > { %1538 = vst [vmem:[%s3228_s10 + $0x58] sm:$0xff] %v2329_v21  ;;  %2338 = vpow2.f32 %v1495_v6  ;;  %v1423_v24 = vadd.f32 %v1422_v9, %v3214_v20  ;;  %v1424_v25 = vpop.f32.mrb[35].mxu0 }
 0x4b3   : > { %2340 = vpow2.f32 %v1497_v22  ;;  %v1425_v27 = vadd.f32 %v1424_v25, %v3216_v5 }
 0x4b4   : > { %v2331_v7 = vpop.eup %2330  ;;  %v1499_v28 = vmul.f32 1.442695, %v1423_v24 }
 0x4b5   : > { %v2333_v29 = vpop.eup %2332  ;;  %1539 = vst [vmem:[%s3228_s10 + $0x60] sm:$0xff] %v2331_v7  ;;  %v1501_v30 = vmul.f32 1.442695, %v1425_v27  ;;  %v1428_v17 = vpop.f32.mrb[36].mxu0 }
 0x4b6   : > { %1540 = vst [vmem:[%s3228_s10 + $0x68] sm:$0xff] %v2333_v29  ;;  %2342 = vpow2.f32 %v1499_v28  ;;  %v1429_v31 = vadd.f32 %v1428_v17, %v3214_v20  ;;  %v1430_v32 = vpop.f32.mrb[37].mxu0 }
 0x4b7   : > { %2344 = vpow2.f32 %v1501_v30  ;;  %v1431_v15 = vadd.f32 %v1430_v32, %v3216_v5 }
 0x4b8   : > { %v2335_v34 = vpop.eup %2334  ;;  %v1503_v35 = vmul.f32 1.442695, %v1429_v31 }
 0x4b9   : > { %v2337_v37 = vpop.eup %2336  ;;  %1541 = vst [vmem:[%s3228_s10 + $0x70] sm:$0xff] %v2335_v34  ;;  %v1505_v38 = vmul.f32 1.442695, %v1431_v15  ;;  %v1434_v39 = vpop.f32.mrb[38].mxu0 }
 0x4ba   : > { %1542 = vst [vmem:[%s3228_s10 + $0x78] sm:$0xff] %v2337_v37  ;;  %2346 = vpow2.f32 %v1503_v35  ;;  %v1435_v40 = vadd.f32 %v1434_v39, %v3214_v20  ;;  %v1436_v43 = vpop.f32.mrb[39].mxu0 }
 0x4bb   : > { %2348 = vpow2.f32 %v1505_v38  ;;  %v1437_v23 = vadd.f32 %v1436_v43, %v3216_v5 }
 0x4bc   : > { %v2339_v26 = vpop.eup %2338  ;;  %v1507_v44 = vmul.f32 1.442695, %v1435_v40 }
 0x4bd   : > { %v2341_v45 = vpop.eup %2340  ;;  %1543 = vst [vmem:[%s3228_s10 + $0x80] sm:$0xff] %v2339_v26  ;;  %v1509_v47 = vmul.f32 1.442695, %v1437_v23  ;;  %v1440_v48 = vpop.f32.mrb[40].mxu0 }
 0x4be   : > { %1544 = vst [vmem:[%s3228_s10 + $0x88] sm:$0xff] %v2341_v45  ;;  %2350 = vpow2.f32 %v1507_v44  ;;  %v1441_v49 = vadd.f32 %v1440_v48, %v3214_v20  ;;  %v1442_v50 = vpop.f32.mrb[41].mxu0 }
 0x4bf   : > { %2352 = vpow2.f32 %v1509_v47  ;;  %v1443_v36 = vadd.f32 %v1442_v50, %v3216_v5 }
 0x4c0   : > { %v2343_v51 = vpop.eup %2342  ;;  %v1511_v53 = vmul.f32 1.442695, %v1441_v49 }
 0x4c1   : > { %v2345_v33 = vpop.eup %2344  ;;  %1545 = vst [vmem:[%s3228_s10 + $0x90] sm:$0xff] %v2343_v51  ;;  %v1513_v54 = vmul.f32 1.442695, %v1443_v36  ;;  %v1446_v55 = vpop.f32.mrb[42].mxu0 }
 0x4c2   : > { %1546 = vst [vmem:[%s3228_s10 + $0x98] sm:$0xff] %v2345_v33  ;;  %2354 = vpow2.f32 %v1511_v53  ;;  %v1447_v57 = vadd.f32 %v1446_v55, %v3214_v20  ;;  %v1448_v58 = vpop.f32.mrb[43].mxu0 }
 0x4c3   : > { %2356 = vpow2.f32 %v1513_v54  ;;  %v1449_v42 = vadd.f32 %v1448_v58, %v3216_v5 }
 0x4c4   : > { %v2347_v46 = vpop.eup %2346  ;;  %v1515_v59 = vmul.f32 1.442695, %v1447_v57 }
 0x4c5   : > { %v2349_v61 = vpop.eup %2348  ;;  %1547 = vst [vmem:[%s3228_s10 + $0xa0] sm:$0xff] %v2347_v46  ;;  %v1517_v41 = vmul.f32 1.442695, %v1449_v42  ;;  %v1452_v62 = vpop.f32.mrb[44].mxu0 }
 0x4c6   : > { %1548 = vst [vmem:[%s3228_s10 + $0xa8] sm:$0xff] %v2349_v61  ;;  %2358 = vpow2.f32 %v1515_v59  ;;  %v1453_v0 = vadd.f32 %v1452_v62, %v3214_v20  ;;  %v1454_v1 = vpop.f32.mrb[45].mxu0 }
 0x4c7   : > { %2360 = vpow2.f32 %v1517_v41  ;;  %v1455_v2 = vadd.f32 %v1454_v1, %v3216_v5 }
 0x4c8   : > { %v2351_v3 = vpop.eup %2350  ;;  %v1519_v4 = vmul.f32 1.442695, %v1453_v0 }
 0x4c9   : > { %v2353_v56 = vpop.eup %2352  ;;  %1549 = vst [vmem:[%s3228_s10 + $0xb0] sm:$0xff] %v2351_v3  ;;  %v1521_v52 = vmul.f32 1.442695, %v1455_v2  ;;  %v1458_v8 = vpop.f32.mrb[46].mxu0 }
 0x4ca   : > { %1550 = vst [vmem:[%s3228_s10 + $0xb8] sm:$0xff] %v2353_v56  ;;  %2362 = vpow2.f32 %v1519_v4  ;;  %v1459_v10 = vadd.f32 %v1458_v8, %v3214_v20  ;;  %v1460_v63 = vpop.f32.mrb[47].mxu0 }
 0x4cb   : > { %2364 = vpow2.f32 %v1521_v52  ;;  %v1461_v11 = vadd.f32 %v1460_v63, %v3216_v5 }
 0x4cc   : > { %v2355_v13 = vpop.eup %2354  ;;  %v1523_v60 = vmul.f32 1.442695, %v1459_v10 }
 0x4cd   : > { %v2357_v14 = vpop.eup %2356  ;;  %1551 = vst [vmem:[%s3228_s10 + $0xc0] sm:$0xff] %v2355_v13  ;;  %v1525_v16 = vmul.f32 1.442695, %v1461_v11 }
 0x4ce   : > { %1552 = vst [vmem:[%s3228_s10 + $0xc8] sm:$0xff] %v2357_v14  ;;  %2366 = vpow2.f32 %v1523_v60 }
 0x4cf   : > { %2368 = vpow2.f32 %v1525_v16 }
 0x4d0   : > { %v2359_v18 = vpop.eup %2358 }
 0x4d1   : > { %v2361_v20 = vpop.eup %2360  ;;  %1553 = vst [vmem:[%s3228_s10 + $0xd0] sm:$0xff] %v2359_v18 }
 0x4d2   : > { %1554 = vst [vmem:[%s3228_s10 + $0xd8] sm:$0xff] %v2361_v20 }
 0x4d4   : > { %v2363_v19 = vpop.eup %2362 }
 0x4d5   : > { %v2365_v5 = vpop.eup %2364  ;;  %1555 = vst [vmem:[%s3228_s10 + $0xe0] sm:$0xff] %v2363_v19 }
 0x4d6   : > { %1556 = vst [vmem:[%s3228_s10 + $0xe8] sm:$0xff] %v2365_v5 }
 0x4d8   : > { %v2367_v12 = vpop.eup %2366 }
 0x4d9   : > { %v2369_v6 = vpop.eup %2368  ;;  %1557 = vst [vmem:[%s3228_s10 + $0xf0] sm:$0xff] %v2367_v12 }
 0x4da   : > { %1558 = vst [vmem:[%s3228_s10 + $0xf8] sm:$0xff] %v2369_v6 }
 0x4db   : > { %2469 = shalt.err (!%p2466_p13)
}
 0x4dc   : > { %s2470_s25 = scalar_lea.hbm %s3289_s15, 4096  ;;  %s2474_s30 = scalar_lea.hbm %s3374_s23, 8192 }
 0x4dd   : > { %p2471_p6 = scmp.ne.s32.totalorder %s3289_s15, %s2470_s25  ;;  %p2475_p7 = scmp.lt.u32.totalorder %s3289_s15, %s3374_s23 }
 0x4de   : > { %p2476_p8 = scmp.lt.u32.totalorder %s2474_s30, %s2470_s25  ;;  %p2478_p0 = scmp.lt.u32.totalorder %s2470_s25, %s3289_s15 }
 0x4df   : > { %p2472_p10 = pnand %p2471_p6, %p3375_p1 }
 0x4e0   : > { %p2477_p11 = por %p2476_p8, %p2475_p7 }
 0x4e1   : > { %p2473_p4 = pneg %p2472_p10 }
 0x4e2   : > { %p2479_p3 = por %p2478_p0, %p2477_p11 }
 0x4e4   : > { %p2480_p5 = pnand %p2479_p3, %p2473_p4 }
 0x4e6   : > { %2483 = shalt.err (!%p2480_p5)
}
 0x4e7   : > { %s2538_s21 = smov 256   ;;  %s2539_s22 = smov 16  }
 0x4e8   : > { %2145 = dma.vmem_to_hbm [thread:$0]  (%p3375_p1), %s3291_s14, 4096, %s3289_s15, %s1576_s17, %s2538_s21, %s2538_s21, %s2539_s22  }
 0x4e9 PF: > { %s3376_s26 = sld [smem:[#allocation12_spill]]  ;;  %s3377_s10 = sld [smem:[#allocation13_spill]] }
 0x4ea   : > { %p3379_p12 = scmp.ge.s32.totalorder %s2526_s20, 2 }
 0x4ef   : > { %s1614_s24 = sand.u32 1, %s3376_s26   ;;  %p3378_p9 = scmp.ne.s32.totalorder %s3377_s10, 0 }
 0x4f0   : > { %s1615_s25 = scalar_lea.sflag [#allocation4], %s1614_s24 }
 0x4f1   : > { %p2159_p2 = pnand %p3379_p12, %p3378_p9 }
 0x4f3   : > { %2509 = dma.done.wait (!%p2159_p2), %s1615_s25, 4096  }
 0x4f4   : > { %2511 = vsyncadd (!%p2159_p2), %s1615_s25, 4294963200  ;;  %p26_p13 = scmp.ge.s32.totalorder %s2713_s13, 4   ;;  %s3380_s17 = smov %s2518_s18 }
 0x4f5   : > { %s3381_s18 = smov %s2522_s19  ;;  %s3382_s19 = smov %s2722_s16 }
 0x4f6   : > { %s3383_s20 = smov %s2713_s13  ;;  %28 = sbr.rel (!%p26_p13) target bundleno = 8 (0x8), region = 128 }
 0x4fd   :  { %1628 = vsyncpa [#allocation3], 1 }
 0x4fe   :  { %1630 = vsyncpa [#allocation3 + $0x1], 1 }
 0x4ff   :  { %1631 = vsyncpa [#allocation6], 1 }
 0x500   :  { %1632 = vsyncpa [#allocation4], 1 }
 0x501   :  { %1634 = vsyncpa [#allocation4 + $0x1], 1 }

</bundles_post_ra>
